<compile_context>
chip_gen: v5e
topology: v5e:2x2
jax: 0.10.0
libtpu: 0.0.40
codegen_flags: <defaults>
</compile_context>

<pallas_src>
import jax
import jax.numpy as jnp
from jax.experimental import pallas as pl
from jax.experimental.pallas import tpu as pltpu

_LANE = 128


def _round_up(c, m=_LANE):
    return ((c + m - 1) // m) * m


def _pick_tile(m, target):
    """Largest tile <= target that divides m and keeps sublane alignment."""
    for t in (2048, 1024, 512, 256, 128, 64, 32, 16, 8):
        if t <= target and m % t == 0:
            return t
    return m


# ----------------------------------------------------------------------------
# Pallas kernels
# ----------------------------------------------------------------------------
def _conv_leaky_kernel(a_ref, b_ref, o_ref):
    """o = leaky_relu(a @ b, 0.2).  a: (tm, K) bf16, b: (K, 128) bf16."""
    acc = jnp.dot(a_ref[...], b_ref[...], preferred_element_type=jnp.float32)
    o_ref[...] = jnp.maximum(acc, 0.2 * acc).astype(o_ref.dtype)


def _conv_stats_kernel(a_ref, b_ref, o_ref, s_ref):
    """Pass 1 of BN layers: raw conv matmul + per-tile (sum, sumsq) partials.

    a: (tm, K) bf16, b: (K, 128) bf16, o: (tm, 128) bf16 raw conv output,
    s: (1, 2, 128) f32 per-tile partial stats.
    """
    acc = jnp.dot(a_ref[...], b_ref[...], preferred_element_type=jnp.float32)
    o_ref[...] = acc.astype(o_ref.dtype)
    s0 = jnp.sum(acc, axis=0, keepdims=True)            # (1, 128)
    s1 = jnp.sum(acc * acc, axis=0, keepdims=True)      # (1, 128)
    s_ref[...] = jnp.concatenate([s0, s1], axis=0).reshape(1, 2, -1)


def _bn_leaky_kernel(x_ref, scale_ref, shift_ref, o_ref):
    """Pass 2: y = x*scale + shift; o = leaky_relu(y, 0.2)."""
    y = x_ref[...].astype(jnp.float32) * scale_ref[...] + shift_ref[...]
    o_ref[...] = jnp.maximum(y, 0.2 * y).astype(o_ref.dtype)


def _bn_leaky_head_kernel(x_ref, scale_ref, shift_ref, w4_ref, o_ref):
    """Layer-3 pass 2 fused with the 4x4/Cout=1 conv + Sigmoid head.

    x: (tn, 16, 128) bf16 raw conv3, scale/shift: (1, 128) f32,
    w4: (16, 128) f32, o: (tn, 1) f32.
    """
    y = (x_ref[...].astype(jnp.float32) * scale_ref[...][None]
         + shift_ref[...][None])
    a = jnp.maximum(y, 0.2 * y)
    s = jnp.sum(a * w4_ref[...][None], axis=1)           # (tn, 128)
    s = jnp.sum(s, axis=-1, keepdims=True)                # (tn, 1)
    o_ref[...] = jax.nn.sigmoid(s)


# ----------------------------------------------------------------------------
# pallas_call wrappers
# ----------------------------------------------------------------------------
def conv_leaky(cols, w_mat, tile_target=2048):
    M, K = cols.shape
    Cp = w_mat.shape[1]
    tm = _pick_tile(M, tile_target)
    return pl.pallas_call(
        _conv_leaky_kernel,
        out_shape=jax.ShapeDtypeStruct((M, Cp), jnp.bfloat16),
        grid_spec=pltpu.PrefetchScalarGridSpec(
            num_scalar_prefetch=0,
            grid=(M // tm,),
            in_specs=[pl.BlockSpec((tm, K), lambda i: (i, 0)),
                      pl.BlockSpec((K, Cp), lambda i: (0, 0))],
            out_specs=pl.BlockSpec((tm, Cp), lambda i: (i, 0))),
        compiler_params=pltpu.CompilerParams(
            dimension_semantics=("parallel",)),
    )(cols, w_mat)


def conv_stats(cols, w_mat, tile_target=1024):
    M, K = cols.shape
    Cp = w_mat.shape[1]
    tm = _pick_tile(M, tile_target)
    n_tiles = M // tm
    raw, stats = pl.pallas_call(
        _conv_stats_kernel,
        out_shape=(jax.ShapeDtypeStruct((M, Cp), jnp.bfloat16),
                   jax.ShapeDtypeStruct((n_tiles, 2, Cp), jnp.float32)),
        grid_spec=pltpu.PrefetchScalarGridSpec(
            num_scalar_prefetch=0,
            grid=(n_tiles,),
            in_specs=[pl.BlockSpec((tm, K), lambda i: (i, 0)),
                      pl.BlockSpec((K, Cp), lambda i: (0, 0))],
            out_specs=(pl.BlockSpec((tm, Cp), lambda i: (i, 0)),
                       pl.BlockSpec((1, 2, Cp), lambda i: (i, 0, 0)))),
        compiler_params=pltpu.CompilerParams(
            dimension_semantics=("parallel",)),
    )(cols, w_mat)
    return raw, stats


def bn_leaky(raw, scale, shift, tile_target=2048):
    M, Cp = raw.shape
    tm = _pick_tile(M, tile_target)
    return pl.pallas_call(
        _bn_leaky_kernel,
        out_shape=jax.ShapeDtypeStruct((M, Cp), jnp.bfloat16),
        grid_spec=pltpu.PrefetchScalarGridSpec(
            num_scalar_prefetch=0,
            grid=(M // tm,),
            in_specs=[pl.BlockSpec((tm, Cp), lambda i: (i, 0)),
                      pl.BlockSpec((1, Cp), lambda i: (0, 0)),
                      pl.BlockSpec((1, Cp), lambda i: (0, 0))],
            out_specs=pl.BlockSpec((tm, Cp), lambda i: (i, 0))),
        compiler_params=pltpu.CompilerParams(
            dimension_semantics=("parallel",)),
    )(raw, scale, shift)


def bn_leaky_head(raw3, scale, shift, w4, sample_tile_target=512):
    """raw3: (N, 16, Cp) raw conv3 output -> (N, 1) sigmoid logits."""
    N, HW, Cp = raw3.shape
    tn = N
    for t in (512, 256, 128, 64, 32, 16, 8):
        if t <= sample_tile_target and N % t == 0:
            tn = t
            break
    return pl.pallas_call(
        _bn_leaky_head_kernel,
        out_shape=jax.ShapeDtypeStruct((N, 1), jnp.float32),
        grid_spec=pltpu.PrefetchScalarGridSpec(
            num_scalar_prefetch=0,
            grid=(N // tn,),
            in_specs=[pl.BlockSpec((tn, HW, Cp), lambda i: (i, 0, 0)),
                      pl.BlockSpec((1, Cp), lambda i: (0, 0)),
                      pl.BlockSpec((1, Cp), lambda i: (0, 0)),
                      pl.BlockSpec((HW, Cp), lambda i: (0, 0))],
            out_specs=pl.BlockSpec((tn, 1), lambda i: (i, 0))),
        compiler_params=pltpu.CompilerParams(
            dimension_semantics=("parallel",)),
    )(raw3, scale, shift, w4)


# ----------------------------------------------------------------------------
# BN affine (tiny per-channel math, plain JAX)
# ----------------------------------------------------------------------------
def _bn_affine(stats, gamma, beta, m, eps=1e-5):
    s = jnp.sum(stats, axis=0)                            # (2, Cp)
    mean = s[0] / m
    var = jnp.maximum(s[1] / m - mean * mean, 0.0)        # biased batch var
    inv_std = jax.lax.rsqrt(var + eps)
    scale = gamma.reshape(-1) * inv_std                   # 0 on padded channels
    shift = beta.reshape(-1) - mean * scale
    cp = scale.shape[0]
    return (scale.reshape(1, cp).astype(jnp.float32),
            shift.reshape(1, cp).astype(jnp.float32))


# ----------------------------------------------------------------------------
# im2col glue (plain JAX: pad / strided slice / reshape only), NHWC layout
# ----------------------------------------------------------------------------
def im2col_nhwc(x, kh, kw, stride, pad):
    """x: (N, H, W, C) -> (N*Ho*Wo, kh*kw*C); column order (i, j, c)."""
    N, H, W, C = x.shape
    xp = jnp.pad(x, ((0, 0), (pad, pad), (pad, pad), (0, 0)))
    Ho = (H + 2 * pad - kh) // stride + 1
    Wo = (W + 2 * pad - kw) // stride + 1
    patches = []
    for i in range(kh):
        for j in range(kw):
            patches.append(
                xp[:, i: i + stride * Ho: stride, j: j + stride * Wo: stride, :])
    p = jnp.concatenate(patches, axis=-1)                 # (N, Ho, Wo, kh*kw*C)
    return p.reshape(N * Ho * Wo, kh * kw * C), Ho, Wo


# ----------------------------------------------------------------------------
# Parameters (PyTorch conv layout in, lane-padded matmul layout out)
# ----------------------------------------------------------------------------
def _prep_weight(w, cout_pad):
    """(Cout, Cin, kh, kw) -> (kh*kw*Cin, cout_pad) bf16; K uses TRUE Cin."""
    Cout, Cin, kh, kw = w.shape
    wm = jnp.transpose(w, (2, 3, 1, 0))                    # (kh, kw, Cin, Cout)
    wm = jnp.pad(wm, ((0, 0), (0, 0), (0, 0), (0, cout_pad - Cout)))
    return wm.reshape(kh * kw * Cin, cout_pad).astype(jnp.bfloat16)


def _pad_vec(v, cpad):
    return jnp.pad(v, (0, cpad - v.shape[0])).reshape(1, cpad).astype(jnp.float32)


def init_params(key, d, channels):
    ks = jax.random.split(key, 4)
    std = 0.02  # DCGAN-style init, deterministic given the key
    w1 = jax.random.normal(ks[0], (d, channels, 4, 4), jnp.float32) * std
    w2 = jax.random.normal(ks[1], (2 * d, d, 4, 4), jnp.float32) * std
    w3 = jax.random.normal(ks[2], (4 * d, 2 * d, 4, 4), jnp.float32) * std
    w4 = jax.random.normal(ks[3], (1, 4 * d, 4, 4), jnp.float32) * std
    g2 = jnp.ones((2 * d,), jnp.float32)
    b2 = jnp.zeros((2 * d,), jnp.float32)
    g3 = jnp.ones((4 * d,), jnp.float32)
    b3 = jnp.zeros((4 * d,), jnp.float32)

    c1p, c2p, c3p = _round_up(d), _round_up(2 * d), _round_up(4 * d)

    # Head weight: (kh*kw, c3p) f32, zero on padded channels; row = i*4 + j
    # matches the (ho*4 + wo) row ordering of the layer-3 conv output.
    w4t = jnp.transpose(w4, (2, 3, 1, 0))[..., 0]          # (4, 4, 4d)
    w4t = jnp.pad(w4t, ((0, 0), (0, 0), (0, c3p - 4 * d)))
    w4m = w4t.reshape(16, c3p).astype(jnp.float32)

    return dict(
        w1m=_prep_weight(w1, c1p),                         # (16*ch,   c1p)
        w2m=_prep_weight(w2, c2p),                         # (16*d,    c2p)
        g2p=_pad_vec(g2, c2p), b2p=_pad_vec(b2, c2p),
        w3m=_prep_weight(w3, c3p),                         # (16*2d,   c3p)
        g3p=_pad_vec(g3, c3p), b3p=_pad_vec(b3, c3p),
        w4m=w4m,
    )


# ----------------------------------------------------------------------------
# Discriminator forward (imgSize < 64 branch)
# ----------------------------------------------------------------------------
def discriminator_forward(params, x_nchw, d):
    """x: (N, channels, 32, 32) NCHW -> (N, 1, 1, 1), matching PyTorch output."""
    N = x_nchw.shape[0]
    x = jnp.transpose(x_nchw, (0, 2, 3, 1)).astype(jnp.bfloat16)   # NHWC bf16

    c1p = params["w1m"].shape[1]
    c2p = params["w2m"].shape[1]
    c3p = params["w3m"].shape[1]

    # Layer 1: Conv(ch -> d, 4, s2, p1) + LeakyReLU(0.2); K stays 16*ch.
    cols, ho, wo = im2col_nhwc(x, 4, 4, 2, 1)
    h = conv_leaky(cols, params["w1m"], tile_target=2048)          # (M1, c1p)
    h = h.reshape(N, ho, wo, c1p)[..., :d]                          # true channels

    # Layer 2: Conv(d -> 2d) + BatchNorm (batch stats) + LeakyReLU, two-pass.
    cols, ho, wo = im2col_nhwc(h, 4, 4, 2, 1)                       # K2 = 16*d
    raw2, st2 = conv_stats(cols, params["w2m"], tile_target=1024)
    sc2, sh2 = _bn_affine(st2, params["g2p"], params["b2p"], cols.shape[0])
    h = bn_leaky(raw2, sc2, sh2, tile_target=2048)
    h = h.reshape(N, ho, wo, c2p)[..., :2 * d]

    # Layer 3: Conv(2d -> 4d) + BN + LeakyReLU, fused with the 4x4/Cout=1
    # Sigmoid head in its normalize pass (layer-3 activation never hits HBM).
    cols, ho, wo = im2col_nhwc(h, 4, 4, 2, 1)                       # K3 = 16*2d
    raw3, st3 = conv_stats(cols, params["w3m"], tile_target=1024)
    sc3, sh3 = _bn_affine(st3, params["g3p"], params["b3p"], cols.shape[0])
    out = bn_leaky_head(raw3.reshape(N, ho * wo, c3p), sc3, sh3, params["w4m"])
    return out.reshape(N, 1, 1, 1)


# ----------------------------------------------------------------------------
if __name__ == "__main__":
    # Shapes consistent with the module (imgSize=32 branch):
    # batch=2, channels=3, imgSize=32, d=32 (first-layer width).
    d, channels, img_size, batch = 32, 3, 32, 2

    key = jax.random.PRNGKey(0)
    k_params, k_x = jax.random.split(key)
    params = init_params(k_params, d, channels)
    x = jax.random.normal(k_x, (batch, channels, img_size, img_size), jnp.float32)

    fwd = jax.jit(lambda inp: discriminator_forward(params, inp, d))
    out = fwd(x)
    jax.block_until_ready(out)

    assert out.shape == (batch, 1, 1, 1), out.shape
    assert bool(jnp.all((out >= 0.0) & (out <= 1.0)))
    print("KERNEL_OK")
</pallas_src>

<mosaic_0001>
module attributes {stable_mosaic.version = 11 : i64} {
  func.func @_conv_leaky_kernel(%arg0: i32, %arg1: memref<512x48xbf16, #tpu.memory_space<vmem>>, %arg2: memref<48x128xbf16, #tpu.memory_space<vmem>>, %arg3: memref<512x128xbf16, #tpu.memory_space<vmem>>) attributes {dimension_semantics = [#tpu.dimension_semantics<parallel>], iteration_bounds = array<i64: 1>, scalar_prefetch = 0 : i64, scratch_operands = 0 : i64, tpu.core_type = #tpu.core_type<tc>, window_params = [{transform_indices = @transform_0, window_bounds = array<i64: 512, 48>}, {pipeline_mode = #tpu.pipeline_mode<synchronous>, transform_indices = @transform_1, window_bounds = array<i64: 48, 128>}, {transform_indices = @transform_2, window_bounds = array<i64: 512, 128>}]} {
    %c0 = arith.constant 0 : index
    %c0_0 = arith.constant 0 : index
    %0 = vector.load %arg1[%c0, %c0_0] : memref<512x48xbf16, #tpu.memory_space<vmem>>, vector<512x48xbf16>
    %c0_1 = arith.constant 0 : index
    %c0_2 = arith.constant 0 : index
    %1 = vector.load %arg2[%c0_1, %c0_2] : memref<48x128xbf16, #tpu.memory_space<vmem>>, vector<48x128xbf16>
    %cst = arith.constant dense<0.000000e+00> : vector<512x128xf32>
    %2 = tpu.matmul %0, %1, %cst {dimension_numbers = #tpu.dot_dimension_numbers<[1], [0], [0], [1], [0, 0, 1, 1], [], []>} : vector<512x48xbf16>, vector<48x128xbf16>, vector<512x128xf32> -> vector<512x128xf32>
    %cst_3 = arith.constant 2.000000e-01 : f32
    %3 = vector.broadcast %cst_3 : f32 to vector<512x128xf32>
    %4 = arith.mulf %3, %2 : vector<512x128xf32>
    %5 = arith.maximumf %2, %4 : vector<512x128xf32>
    %6 = arith.truncf %5 : vector<512x128xf32> to vector<512x128xbf16>
    %c0_4 = arith.constant 0 : index
    %c0_5 = arith.constant 0 : index
    %7 = vector.load %arg3[%c0_4, %c0_5] : memref<512x128xbf16, #tpu.memory_space<vmem>>, vector<512x128xbf16>
    tpu.vector_store %arg3[%c0_4, %c0_5], %6 {strides = array<i32>} : memref<512x128xbf16, #tpu.memory_space<vmem>>, vector<512x128xbf16>,
    return
  }
  func.func @transform_0(%arg0: i32) -> (i32, i32) {
    %c0_i32 = arith.constant 0 : i32
    %c0_i32_0 = arith.constant 0 : i32
    return %arg0, %c0_i32 : i32, i32
  }
  func.func @transform_1(%arg0: i32) -> (i32, i32) {
    %c0_i32 = arith.constant 0 : i32
    %c0_i32_0 = arith.constant 0 : i32
    %c0_i32_1 = arith.constant 0 : i32
    return %c0_i32, %c0_i32_0 : i32, i32
  }
  func.func @transform_2(%arg0: i32) -> (i32, i32) {
    %c0_i32 = arith.constant 0 : i32
    %c0_i32_0 = arith.constant 0 : i32
    return %arg0, %c0_i32 : i32, i32
  }
}

module attributes {stable_mosaic.version = 11 : i64} {
  func.func @_bn_leaky_kernel(%arg0: i32, %arg1: memref<128x128xbf16, #tpu.memory_space<vmem>>, %arg2: memref<1x128xf32, #tpu.memory_space<vmem>>, %arg3: memref<1x128xf32, #tpu.memory_space<vmem>>, %arg4: memref<128x128xbf16, #tpu.memory_space<vmem>>) attributes {dimension_semantics = [#tpu.dimension_semantics<parallel>], iteration_bounds = array<i64: 1>, scalar_prefetch = 0 : i64, scratch_operands = 0 : i64, tpu.core_type = #tpu.core_type<tc>, window_params = [{transform_indices = @transform_0, window_bounds = array<i64: 128, 128>}, {pipeline_mode = #tpu.pipeline_mode<synchronous>, transform_indices = @transform_1, window_bounds = array<i64: 1, 128>}, {pipeline_mode = #tpu.pipeline_mode<synchronous>, transform_indices = @transform_2, window_bounds = array<i64: 1, 128>}, {transform_indices = @transform_3, window_bounds = array<i64: 128, 128>}]} {
    %c0 = arith.constant 0 : index
    %c0_0 = arith.constant 0 : index
    %0 = vector.load %arg1[%c0, %c0_0] : memref<128x128xbf16, #tpu.memory_space<vmem>>, vector<128x128xbf16>
    %1 = arith.extf %0 : vector<128x128xbf16> to vector<128x128xf32>
    %c0_1 = arith.constant 0 : index
    %c0_2 = arith.constant 0 : index
    %2 = vector.load %arg2[%c0_1, %c0_2] : memref<1x128xf32, #tpu.memory_space<vmem>>, vector<1x128xf32>
    %3 = vector.broadcast %2 : vector<1x128xf32> to vector<128x128xf32>
    %4 = arith.mulf %1, %3 : vector<128x128xf32>
    %c0_3 = arith.constant 0 : index
    %c0_4 = arith.constant 0 : index
    %5 = vector.load %arg3[%c0_3, %c0_4] : memref<1x128xf32, #tpu.memory_space<vmem>>, vector<1x128xf32>
    %6 = vector.broadcast %5 : vector<1x128xf32> to vector<128x128xf32>
    %7 = arith.addf %4, %6 : vector<128x128xf32>
    %cst = arith.constant 2.000000e-01 : f32
    %8 = vector.broadcast %cst : f32 to vector<128x128xf32>
    %9 = arith.mulf %8, %7 : vector<128x128xf32>
    %10 = arith.maximumf %7, %9 : vector<128x128xf32>
    %11 = arith.truncf %10 : vector<128x128xf32> to vector<128x128xbf16>
    %c0_5 = arith.constant 0 : index
    %c0_6 = arith.constant 0 : index
    %12 = vector.load %arg4[%c0_5, %c0_6] : memref<128x128xbf16, #tpu.memory_space<vmem>>, vector<128x128xbf16>
    tpu.vector_store %arg4[%c0_5, %c0_6], %11 {strides = array<i32>} : memref<128x128xbf16, #tpu.memory_space<vmem>>, vector<128x128xbf16>,
    return
  }
  func.func @transform_0(%arg0: i32) -> (i32, i32) {
    %c0_i32 = arith.constant 0 : i32
    %c0_i32_0 = arith.constant 0 : i32
    return %arg0, %c0_i32 : i32, i32
  }
  func.func @transform_1(%arg0: i32) -> (i32, i32) {
    %c0_i32 = arith.constant 0 : i32
    %c0_i32_0 = arith.constant 0 : i32
    %c0_i32_1 = arith.constant 0 : i32
    return %c0_i32, %c0_i32_0 : i32, i32
  }
  func.func @transform_2(%arg0: i32) -> (i32, i32) {
    %c0_i32 = arith.constant 0 : i32
    %c0_i32_0 = arith.constant 0 : i32
    %c0_i32_1 = arith.constant 0 : i32
    return %c0_i32, %c0_i32_0 : i32, i32
  }
  func.func @transform_3(%arg0: i32) -> (i32, i32) {
    %c0_i32 = arith.constant 0 : i32
    %c0_i32_0 = arith.constant 0 : i32
    return %arg0, %c0_i32 : i32, i32
  }
}

module attributes {stable_mosaic.version = 11 : i64} {
  func.func @_conv_stats_kernel(%arg0: i32, %arg1: memref<128x512xbf16, #tpu.memory_space<vmem>>, %arg2: memref<512x128xbf16, #tpu.memory_space<vmem>>, %arg3: memref<128x128xbf16, #tpu.memory_space<vmem>>, %arg4: memref<1x2x128xf32, #tpu.memory_space<vmem>>) attributes {dimension_semantics = [#tpu.dimension_semantics<parallel>], iteration_bounds = array<i64: 1>, scalar_prefetch = 0 : i64, scratch_operands = 0 : i64, tpu.core_type = #tpu.core_type<tc>, window_params = [{transform_indices = @transform_0, window_bounds = array<i64: 128, 512>}, {pipeline_mode = #tpu.pipeline_mode<synchronous>, transform_indices = @transform_1, window_bounds = array<i64: 512, 128>}, {transform_indices = @transform_2, window_bounds = array<i64: 128, 128>}, {transform_indices = @transform_3, window_bounds = array<i64: 1, 2, 128>}]} {
    %c0 = arith.constant 0 : index
    %c0_0 = arith.constant 0 : index
    %0 = vector.load %arg1[%c0, %c0_0] : memref<128x512xbf16, #tpu.memory_space<vmem>>, vector<128x512xbf16>
    %c0_1 = arith.constant 0 : index
    %c0_2 = arith.constant 0 : index
    %1 = vector.load %arg2[%c0_1, %c0_2] : memref<512x128xbf16, #tpu.memory_space<vmem>>, vector<512x128xbf16>
    %cst = arith.constant dense<0.000000e+00> : vector<128x128xf32>
    %2 = tpu.matmul %0, %1, %cst {dimension_numbers = #tpu.dot_dimension_numbers<[1], [0], [0], [1], [0, 0, 1, 1], [], []>} : vector<128x512xbf16>, vector<512x128xbf16>, vector<128x128xf32> -> vector<128x128xf32>
    %3 = arith.truncf %2 : vector<128x128xf32> to vector<128x128xbf16>
    %c0_3 = arith.constant 0 : index
    %c0_4 = arith.constant 0 : index
    %4 = vector.load %arg3[%c0_3, %c0_4] : memref<128x128xbf16, #tpu.memory_space<vmem>>, vector<128x128xbf16>
    tpu.vector_store %arg3[%c0_3, %c0_4], %3 {strides = array<i32>} : memref<128x128xbf16, #tpu.memory_space<vmem>>, vector<128x128xbf16>,
    %cst_5 = arith.constant dense<0.000000e+00> : vector<128xf32>
    %5 = vector.multi_reduction <add>, %2, %cst_5 [0] : vector<128x128xf32> to vector<128xf32>
    %6 = vector.shape_cast %5 : vector<128xf32> to vector<1x128xf32>
    %7 = arith.mulf %2, %2 : vector<128x128xf32>
    %cst_6 = arith.constant dense<0.000000e+00> : vector<128xf32>
    %8 = vector.multi_reduction <add>, %7, %cst_6 [0] : vector<128x128xf32> to vector<128xf32>
    %9 = vector.shape_cast %8 : vector<128xf32> to vector<1x128xf32>
    %10 = tpu.concatenate %6, %9 in 0 : vector<1x128xf32>, vector<1x128xf32> -> vector<2x128xf32>
    %11 = vector.shape_cast %10 : vector<2x128xf32> to vector<1x2x128xf32>
    %c0_7 = arith.constant 0 : index
    %c0_8 = arith.constant 0 : index
    %c0_9 = arith.constant 0 : index
    %12 = vector.load %arg4[%c0_7, %c0_8, %c0_9] : memref<1x2x128xf32, #tpu.memory_space<vmem>>, vector<1x2x128xf32>
    tpu.vector_store %arg4[%c0_7, %c0_8, %c0_9], %11 {strides = array<i32>} : memref<1x2x128xf32, #tpu.memory_space<vmem>>, vector<1x2x128xf32>,
    return
  }
  func.func @transform_0(%arg0: i32) -> (i32, i32) {
    %c0_i32 = arith.constant 0 : i32
    %c0_i32_0 = arith.constant 0 : i32
    return %arg0, %c0_i32 : i32, i32
  }
  func.func @transform_1(%arg0: i32) -> (i32, i32) {
    %c0_i32 = arith.constant 0 : i32
    %c0_i32_0 = arith.constant 0 : i32
    %c0_i32_1 = arith.constant 0 : i32
    return %c0_i32, %c0_i32_0 : i32, i32
  }
  func.func @transform_2(%arg0: i32) -> (i32, i32) {
    %c0_i32 = arith.constant 0 : i32
    %c0_i32_0 = arith.constant 0 : i32
    return %arg0, %c0_i32 : i32, i32
  }
  func.func @transform_3(%arg0: i32) -> (i32, i32, i32) {
    %c0_i32 = arith.constant 0 : i32
    %c0_i32_0 = arith.constant 0 : i32
    %c0_i32_1 = arith.constant 0 : i32
    return %arg0, %c0_i32, %c0_i32_0 : i32, i32, i32
  }
}

module attributes {stable_mosaic.version = 11 : i64} {
  func.func @_bn_leaky_head_kernel(%arg0: i32, %arg1: memref<2x16x128xbf16, #tpu.memory_space<vmem>>, %arg2: memref<1x128xf32, #tpu.memory_space<vmem>>, %arg3: memref<1x128xf32, #tpu.memory_space<vmem>>, %arg4: memref<16x128xf32, #tpu.memory_space<vmem>>, %arg5: memref<2x1xf32, #tpu.memory_space<vmem>>) attributes {dimension_semantics = [#tpu.dimension_semantics<parallel>], iteration_bounds = array<i64: 1>, scalar_prefetch = 0 : i64, scratch_operands = 0 : i64, tpu.core_type = #tpu.core_type<tc>, window_params = [{transform_indices = @transform_0, window_bounds = array<i64: 2, 16, 128>}, {pipeline_mode = #tpu.pipeline_mode<synchronous>, transform_indices = @transform_1, window_bounds = array<i64: 1, 128>}, {pipeline_mode = #tpu.pipeline_mode<synchronous>, transform_indices = @transform_2, window_bounds = array<i64: 1, 128>}, {pipeline_mode = #tpu.pipeline_mode<synchronous>, transform_indices = @transform_3, window_bounds = array<i64: 16, 128>}, {transform_indices = @transform_4, window_bounds = array<i64: 2, 1>}]} {
    %c0 = arith.constant 0 : index
    %c0_0 = arith.constant 0 : index
    %c0_1 = arith.constant 0 : index
    %0 = vector.load %arg1[%c0, %c0_0, %c0_1] : memref<2x16x128xbf16, #tpu.memory_space<vmem>>, vector<2x16x128xbf16>
    %1 = arith.extf %0 : vector<2x16x128xbf16> to vector<2x16x128xf32>
    %c0_2 = arith.constant 0 : index
    %c0_3 = arith.constant 0 : index
    %2 = vector.load %arg2[%c0_2, %c0_3] : memref<1x128xf32, #tpu.memory_space<vmem>>, vector<1x128xf32>
    %3 = vector.shape_cast %2 : vector<1x128xf32> to vector<1x1x128xf32>
    %4 = vector.broadcast %3 : vector<1x1x128xf32> to vector<2x16x128xf32>
    %5 = arith.mulf %1, %4 : vector<2x16x128xf32>
    %c0_4 = arith.constant 0 : index
    %c0_5 = arith.constant 0 : index
    %6 = vector.load %arg3[%c0_4, %c0_5] : memref<1x128xf32, #tpu.memory_space<vmem>>, vector<1x128xf32>
    %7 = vector.shape_cast %6 : vector<1x128xf32> to vector<1x1x128xf32>
    %8 = vector.broadcast %7 : vector<1x1x128xf32> to vector<2x16x128xf32>
    %9 = arith.addf %5, %8 : vector<2x16x128xf32>
    %cst = arith.constant 2.000000e-01 : f32
    %10 = vector.broadcast %cst : f32 to vector<2x16x128xf32>
    %11 = arith.mulf %10, %9 : vector<2x16x128xf32>
    %12 = arith.maximumf %9, %11 : vector<2x16x128xf32>
    %c0_6 = arith.constant 0 : index
    %c0_7 = arith.constant 0 : index
    %13 = vector.load %arg4[%c0_6, %c0_7] : memref<16x128xf32, #tpu.memory_space<vmem>>, vector<16x128xf32>
    %14 = vector.shape_cast %13 : vector<16x128xf32> to vector<1x16x128xf32>
    %15 = vector.broadcast %14 : vector<1x16x128xf32> to vector<2x16x128xf32>
    %16 = arith.mulf %12, %15 : vector<2x16x128xf32>
    %cst_8 = arith.constant dense<0.000000e+00> : vector<2x128xf32>
    %17 = vector.multi_reduction <add>, %16, %cst_8 [1] : vector<2x16x128xf32> to vector<2x128xf32>
    %cst_9 = arith.constant dense<0.000000e+00> : vector<2xf32>
    %18 = vector.multi_reduction <add>, %17, %cst_9 [1] : vector<2x128xf32> to vector<2xf32>
    %19 = vector.shape_cast %18 : vector<2xf32> to vector<2x1xf32>
    %20 = arith.negf %19 : vector<2x1xf32>
    %21 = math.exp %20 : vector<2x1xf32>
    %cst_10 = arith.constant 1.000000e+00 : f32
    %22 = vector.broadcast %cst_10 : f32 to vector<2x1xf32>
    %23 = arith.addf %22, %21 : vector<2x1xf32>
    %24 = arith.divf %22, %23 : vector<2x1xf32>
    %c0_11 = arith.constant 0 : index
    %c0_12 = arith.constant 0 : index
    %25 = vector.load %arg5[%c0_11, %c0_12] : memref<2x1xf32, #tpu.memory_space<vmem>>, vector<2x1xf32>
    tpu.vector_store %arg5[%c0_11, %c0_12], %24 {strides = array<i32>} : memref<2x1xf32, #tpu.memory_space<vmem>>, vector<2x1xf32>,
    return
  }
  func.func @transform_0(%arg0: i32) -> (i32, i32, i32) {
    %c0_i32 = arith.constant 0 : i32
    %c0_i32_0 = arith.constant 0 : i32
    %c0_i32_1 = arith.constant 0 : i32
    return %arg0, %c0_i32, %c0_i32_0 : i32, i32, i32
  }
  func.func @transform_1(%arg0: i32) -> (i32, i32) {
    %c0_i32 = arith.constant 0 : i32
    %c0_i32_0 = arith.constant 0 : i32
    %c0_i32_1 = arith.constant 0 : i32
    return %c0_i32, %c0_i32_0 : i32, i32
  }
  func.func @transform_2(%arg0: i32) -> (i32, i32) {
    %c0_i32 = arith.constant 0 : i32
    %c0_i32_0 = arith.constant 0 : i32
    %c0_i32_1 = arith.constant 0 : i32
    return %c0_i32, %c0_i32_0 : i32, i32
  }
  func.func @transform_3(%arg0: i32) -> (i32, i32) {
    %c0_i32 = arith.constant 0 : i32
    %c0_i32_0 = arith.constant 0 : i32
    %c0_i32_1 = arith.constant 0 : i32
    return %c0_i32, %c0_i32_0 : i32, i32
  }
  func.func @transform_4(%arg0: i32) -> (i32, i32) {
    %c0_i32 = arith.constant 0 : i32
    %c0_i32_0 = arith.constant 0 : i32
    return %arg0, %c0_i32 : i32, i32
  }
}

module attributes {stable_mosaic.version = 11 : i64} {
  func.func @_conv_stats_kernel(%arg0: i32, %arg1: memref<32x1024xbf16, #tpu.memory_space<vmem>>, %arg2: memref<1024x128xbf16, #tpu.memory_space<vmem>>, %arg3: memref<32x128xbf16, #tpu.memory_space<vmem>>, %arg4: memref<1x2x128xf32, #tpu.memory_space<vmem>>) attributes {dimension_semantics = [#tpu.dimension_semantics<parallel>], iteration_bounds = array<i64: 1>, scalar_prefetch = 0 : i64, scratch_operands = 0 : i64, tpu.core_type = #tpu.core_type<tc>, window_params = [{transform_indices = @transform_0, window_bounds = array<i64: 32, 1024>}, {pipeline_mode = #tpu.pipeline_mode<synchronous>, transform_indices = @transform_1, window_bounds = array<i64: 1024, 128>}, {transform_indices = @transform_2, window_bounds = array<i64: 32, 128>}, {transform_indices = @transform_3, window_bounds = array<i64: 1, 2, 128>}]} {
    %c0 = arith.constant 0 : index
    %c0_0 = arith.constant 0 : index
    %0 = vector.load %arg1[%c0, %c0_0] : memref<32x1024xbf16, #tpu.memory_space<vmem>>, vector<32x1024xbf16>
    %c0_1 = arith.constant 0 : index
    %c0_2 = arith.constant 0 : index
    %1 = vector.load %arg2[%c0_1, %c0_2] : memref<1024x128xbf16, #tpu.memory_space<vmem>>, vector<1024x128xbf16>
    %cst = arith.constant dense<0.000000e+00> : vector<32x128xf32>
    %2 = tpu.matmul %0, %1, %cst {dimension_numbers = #tpu.dot_dimension_numbers<[1], [0], [0], [1], [0, 0, 1, 1], [], []>} : vector<32x1024xbf16>, vector<1024x128xbf16>, vector<32x128xf32> -> vector<32x128xf32>
    %3 = arith.truncf %2 : vector<32x128xf32> to vector<32x128xbf16>
    %c0_3 = arith.constant 0 : index
    %c0_4 = arith.constant 0 : index
    %4 = vector.load %arg3[%c0_3, %c0_4] : memref<32x128xbf16, #tpu.memory_space<vmem>>, vector<32x128xbf16>
    tpu.vector_store %arg3[%c0_3, %c0_4], %3 {strides = array<i32>} : memref<32x128xbf16, #tpu.memory_space<vmem>>, vector<32x128xbf16>,
    %cst_5 = arith.constant dense<0.000000e+00> : vector<128xf32>
    %5 = vector.multi_reduction <add>, %2, %cst_5 [0] : vector<32x128xf32> to vector<128xf32>
    %6 = vector.shape_cast %5 : vector<128xf32> to vector<1x128xf32>
    %7 = arith.mulf %2, %2 : vector<32x128xf32>
    %cst_6 = arith.constant dense<0.000000e+00> : vector<128xf32>
    %8 = vector.multi_reduction <add>, %7, %cst_6 [0] : vector<32x128xf32> to vector<128xf32>
    %9 = vector.shape_cast %8 : vector<128xf32> to vector<1x128xf32>
    %10 = tpu.concatenate %6, %9 in 0 : vector<1x128xf32>, vector<1x128xf32> -> vector<2x128xf32>
    %11 = vector.shape_cast %10 : vector<2x128xf32> to vector<1x2x128xf32>
    %c0_7 = arith.constant 0 : index
    %c0_8 = arith.constant 0 : index
    %c0_9 = arith.constant 0 : index
    %12 = vector.load %arg4[%c0_7, %c0_8, %c0_9] : memref<1x2x128xf32, #tpu.memory_space<vmem>>, vector<1x2x128xf32>
    tpu.vector_store %arg4[%c0_7, %c0_8, %c0_9], %11 {strides = array<i32>} : memref<1x2x128xf32, #tpu.memory_space<vmem>>, vector<1x2x128xf32>,
    return
  }
  func.func @transform_0(%arg0: i32) -> (i32, i32) {
    %c0_i32 = arith.constant 0 : i32
    %c0_i32_0 = arith.constant 0 : i32
    return %arg0, %c0_i32 : i32, i32
  }
  func.func @transform_1(%arg0: i32) -> (i32, i32) {
    %c0_i32 = arith.constant 0 : i32
    %c0_i32_0 = arith.constant 0 : i32
    %c0_i32_1 = arith.constant 0 : i32
    return %c0_i32, %c0_i32_0 : i32, i32
  }
  func.func @transform_2(%arg0: i32) -> (i32, i32) {
    %c0_i32 = arith.constant 0 : i32
    %c0_i32_0 = arith.constant 0 : i32
    return %arg0, %c0_i32 : i32, i32
  }
  func.func @transform_3(%arg0: i32) -> (i32, i32, i32) {
    %c0_i32 = arith.constant 0 : i32
    %c0_i32_0 = arith.constant 0 : i32
    %c0_i32_1 = arith.constant 0 : i32
    return %arg0, %c0_i32, %c0_i32_0 : i32, i32, i32
  }
}

</mosaic_0001>

<bundles_post_ra>
// kernel: _lambda_.5
= control target key start
LH: loop header
LB: loop body
LE: loop exit
PB: predicated region body
PF: predicated region fallthrough
CT: control target
= control target key end

     0   :  { %vm260_vm0 = vcmask 392192   ;;  %s1441_s1 = inlined_call_operand.vmem [shape: bf16[48,128], index: 1, kind: input, shape index: {}]   ;;  %s1442_s0 = inlined_call_operand.vmem [shape: bf16[512,48], index: 0, kind: input, shape index: {}]   ;;  %s1443_s2 = inlined_call_operand.vmem [shape: bf16[512,128], index: 2, kind: output, shape index: {}]  }
   0x1   :  { %v992_v0 = vld [vmem:[%s1441_s1 + $0x10] sm:$0xff]  ;;  %v991_v1 = vld [vmem:[%s1441_s1 + $0x8] sm:$0xff]  ;;  %v990_v2 = vld [vmem:[%s1441_s1] sm:$0xff] }
   0x2   :  { %362 = vmatpush.bf16.msra.mxu0 %v992_v0  ;;  %1184 = vmatpush.bf16.msra.mxu1 %v992_v0  ;;  %v958_v3 = vld [vmem:[%s1442_s0] sm:$0xff]  ;;  %v959_v7 = vld [vmem:[%s1442_s0 + $0x8] sm:$0xff]  ;;  %v960_v11 = vld [vmem:[%s1442_s0 + $0x10] sm:$0xff] }
   0x3   :  { %1185 = vmatpush.bf16.msra.mxu2 %v992_v0  ;;  %1186 = vmatpush.bf16.msra.mxu3 %v992_v0  ;;  %v966_v4 = vld [vmem:[%s1442_s0 + $0x40] sm:$0xff]  ;;  %v967_v8 = vld [vmem:[%s1442_s0 + $0x48] sm:$0xff]  ;;  %v968_v12 = vld [vmem:[%s1442_s0 + $0x50] sm:$0xff] }
   0x4   :  { %v974_v5 = vld [vmem:[%s1442_s0 + $0x80] sm:$0xff]  ;;  %v975_v9 = vld [vmem:[%s1442_s0 + $0x88] sm:$0xff]  ;;  %v976_v13 = vld [vmem:[%s1442_s0 + $0x90] sm:$0xff] }
   0x5   :  { %v982_v6 = vld [vmem:[%s1442_s0 + $0xc0] sm:$0xff]  ;;  %v983_v10 = vld [vmem:[%s1442_s0 + $0xc8] sm:$0xff]  ;;  %v984_v14 = vld [vmem:[%s1442_s0 + $0xd0] sm:$0xff] }
   0x6   :  { %363 = vmatpush.bf16.msra.mxu0 %v991_v1  ;;  %1187 = vmatpush.bf16.msra.mxu1 %v991_v1  ;;  %v961_v15 = vld [vmem:[%s1442_s0 + $0x18] sm:$0xff]  ;;  %v962_v19 = vld [vmem:[%s1442_s0 + $0x20] sm:$0xff]  ;;  %v963_v23 = vld [vmem:[%s1442_s0 + $0x28] sm:$0xff] }
   0x7   :  { %1188 = vmatpush.bf16.msra.mxu2 %v991_v1  ;;  %1189 = vmatpush.bf16.msra.mxu3 %v991_v1  ;;  %v969_v16 = vld [vmem:[%s1442_s0 + $0x58] sm:$0xff]  ;;  %v970_v20 = vld [vmem:[%s1442_s0 + $0x60] sm:$0xff]  ;;  %v971_v24 = vld [vmem:[%s1442_s0 + $0x68] sm:$0xff] }
   0x8   :  { %v977_v17 = vld [vmem:[%s1442_s0 + $0x98] sm:$0xff]  ;;  %v978_v21 = vld [vmem:[%s1442_s0 + $0xa0] sm:$0xff]  ;;  %v979_v25 = vld [vmem:[%s1442_s0 + $0xa8] sm:$0xff] }
   0x9   :  { %v985_v18 = vld [vmem:[%s1442_s0 + $0xd8] sm:$0xff]  ;;  %v986_v22 = vld [vmem:[%s1442_s0 + $0xe0] sm:$0xff]  ;;  %v987_v26 = vld [vmem:[%s1442_s0 + $0xe8] sm:$0xff] }
   0xa   :  { %364 = vmatpush.bf16.msra.mxu0 %v990_v2  ;;  %1190 = vmatpush.bf16.msra.mxu1 %v990_v2  ;;  %v964_v27 = vld [vmem:[%s1442_s0 + $0x30] sm:$0xff]  ;;  %v965_v31 = vld [vmem:[%s1442_s0 + $0x38] sm:$0xff] }
   0xb   :  { %1191 = vmatpush.bf16.msra.mxu2 %v990_v2  ;;  %1192 = vmatpush.bf16.msra.mxu3 %v990_v2  ;;  %v972_v28 = vld [vmem:[%s1442_s0 + $0x70] sm:$0xff]  ;;  %v973_v32 = vld [vmem:[%s1442_s0 + $0x78] sm:$0xff] }
   0xc   :  { %v980_v29 = vld [vmem:[%s1442_s0 + $0xb0] sm:$0xff]  ;;  %v981_v33 = vld [vmem:[%s1442_s0 + $0xb8] sm:$0xff] }
   0xd   :  { %926 = vmatmul.msk.bf16.vlgmr.msra.gmra.mxu0 %vm260_vm0, %v958_v3  ;;  %934 = vmatmul.msk.bf16.vlgmr.msra.gmra.mxu1 %vm260_vm0, %v966_v4  ;;  %v988_v30 = vld [vmem:[%s1442_s0 + $0xf0] sm:$0xff]  ;;  %v989_v34 = vld [vmem:[%s1442_s0 + $0xf8] sm:$0xff] }
   0xe   :  { %942 = vmatmul.msk.bf16.vlgmr.msra.gmra.mxu2 %vm260_vm0, %v974_v5  ;;  %950 = vmatmul.msk.bf16.vlgmr.msra.gmra.mxu3 %vm260_vm0, %v982_v6 }
  0x1d   :  { %927 = vmatmul.msk.bf16.gmra.mxu0 %vm260_vm0, %v959_v7  ;;  %935 = vmatmul.msk.bf16.gmra.mxu1 %vm260_vm0, %v967_v8 }
  0x1e   :  { %943 = vmatmul.msk.bf16.gmra.mxu2 %vm260_vm0, %v975_v9  ;;  %951 = vmatmul.msk.bf16.gmra.mxu3 %vm260_vm0, %v983_v10 }
  0x2d   :  { %928 = vmatmul.msk.bf16.gmra.mxu0 %vm260_vm0, %v960_v11  ;;  %936 = vmatmul.msk.bf16.gmra.mxu1 %vm260_vm0, %v968_v12 }
  0x2e   :  { %944 = vmatmul.msk.bf16.gmra.mxu2 %vm260_vm0, %v976_v13  ;;  %952 = vmatmul.msk.bf16.gmra.mxu3 %vm260_vm0, %v984_v14 }
  0x3d   :  { %929 = vmatmul.msk.bf16.gmra.mxu0 %vm260_vm0, %v961_v15  ;;  %937 = vmatmul.msk.bf16.gmra.mxu1 %vm260_vm0, %v969_v16 }
  0x3e   :  { %945 = vmatmul.msk.bf16.gmra.mxu2 %vm260_vm0, %v977_v17  ;;  %953 = vmatmul.msk.bf16.gmra.mxu3 %vm260_vm0, %v985_v18 }
  0x4d   :  { %930 = vmatmul.msk.bf16.gmra.mxu0 %vm260_vm0, %v962_v19  ;;  %938 = vmatmul.msk.bf16.gmra.mxu1 %vm260_vm0, %v970_v20 }
  0x4e   :  { %946 = vmatmul.msk.bf16.gmra.mxu2 %vm260_vm0, %v978_v21  ;;  %954 = vmatmul.msk.bf16.gmra.mxu3 %vm260_vm0, %v986_v22 }
  0x5d   :  { %931 = vmatmul.msk.bf16.gmra.mxu0 %vm260_vm0, %v963_v23  ;;  %939 = vmatmul.msk.bf16.gmra.mxu1 %vm260_vm0, %v971_v24 }
  0x5e   :  { %947 = vmatmul.msk.bf16.gmra.mxu2 %vm260_vm0, %v979_v25  ;;  %955 = vmatmul.msk.bf16.gmra.mxu3 %vm260_vm0, %v987_v26 }
  0x6d   :  { %932 = vmatmul.msk.bf16.gmra.mxu0 %vm260_vm0, %v964_v27  ;;  %940 = vmatmul.msk.bf16.gmra.mxu1 %vm260_vm0, %v972_v28 }
  0x6e   :  { %948 = vmatmul.msk.bf16.gmra.mxu2 %vm260_vm0, %v980_v29  ;;  %956 = vmatmul.msk.bf16.gmra.mxu3 %vm260_vm0, %v988_v30 }
  0x7d   :  { %933 = vmatmul.msk.bf16.gmra.mxu0 %vm260_vm0, %v965_v31  ;;  %941 = vmatmul.msk.bf16.gmra.mxu1 %vm260_vm0, %v973_v32 }
  0x7e   :  { %949 = vmatmul.msk.bf16.gmra.mxu2 %vm260_vm0, %v981_v33  ;;  %957 = vmatmul.msk.bf16.gmra.mxu3 %vm260_vm0, %v989_v34 }
  0x8a   :  { %v366_v35 = vpop.f32.mrf.mxu0  ;;  %v406_v36 = vpop.f32.mrf.mxu1 }
  0x8b   :  { %v526_v37 = vmul.f32 0.2, %v366_v35  ;;  %v542_v38 = vmul.f32 0.2, %v406_v36 }
  0x8d   :  { %v590_v45 = vmax.f32 %v366_v35, %v526_v37  ;;  %v606_v46 = vmax.f32 %v406_v36, %v542_v38 }
  0x91   :  { %v446_v39 = vpop.f32.mrf.mxu2  ;;  %v486_v40 = vpop.f32.mrf.mxu3 }
  0x92   :  { %v368_v41 = vpop.f32.mrf.mxu0  ;;  %v408_v42 = vpop.f32.mrf.mxu1  ;;  %v558_v51 = vmul.f32 0.2, %v446_v39  ;;  %v574_v52 = vmul.f32 0.2, %v486_v40 }
  0x93   :  { %v527_v43 = vmul.f32 0.2, %v368_v41  ;;  %v543_v44 = vmul.f32 0.2, %v408_v42 }
  0x94   :  { %v622_v59 = vmax.f32 %v446_v39, %v558_v51  ;;  %v638_v60 = vmax.f32 %v486_v40, %v574_v52 }
  0x95   :  { %v591_v47 = vmax.f32 %v368_v41, %v527_v43  ;;  %v607_v48 = vmax.f32 %v408_v42, %v543_v44 }
  0x97   :  { %v996_v49 = vpack.c.bf16 %v591_v47, %v590_v45  ;;  %v1036_v50 = vpack.c.bf16 %v607_v48, %v606_v46 }
  0x99   :  { %997 = vst [vmem:[%s1443_s2] sm:$0xff] %v996_v49   ;;  %v448_v53 = vpop.f32.mrf.mxu2  ;;  %v488_v54 = vpop.f32.mrf.mxu3 }
  0x9a   :  { %1160 = vst [vmem:[%s1443_s2 + $0x40] sm:$0xff] %v1036_v50   ;;  %v559_v55 = vmul.f32 0.2, %v448_v53  ;;  %v575_v56 = vmul.f32 0.2, %v488_v54  ;;  %v371_v57 = vpop.f32.mrf.mxu0  ;;  %v411_v58 = vpop.f32.mrf.mxu1 }
  0x9b   :  { %v528_v1 = vmul.f32 0.2, %v371_v57  ;;  %v544_v2 = vmul.f32 0.2, %v411_v58 }
  0x9c   :  { %v623_v61 = vmax.f32 %v448_v53, %v559_v55  ;;  %v639_v62 = vmax.f32 %v488_v54, %v575_v56 }
  0x9d   :  { %v592_v9 = vmax.f32 %v371_v57, %v528_v1  ;;  %v608_v10 = vmax.f32 %v411_v58, %v544_v2 }
  0x9e   :  { %v1076_v63 = vpack.c.bf16 %v623_v61, %v622_v59  ;;  %v1116_v0 = vpack.c.bf16 %v639_v62, %v638_v60 }
  0xa0   :  { %1168 = vst [vmem:[%s1443_s2 + $0x80] sm:$0xff] %v1076_v63  }
  0xa1   :  { %1176 = vst [vmem:[%s1443_s2 + $0xc0] sm:$0xff] %v1116_v0   ;;  %v451_v3 = vpop.f32.mrf.mxu2  ;;  %v491_v4 = vpop.f32.mrf.mxu3 }
  0xa2   :  { %v373_v5 = vpop.f32.mrf.mxu0  ;;  %v413_v6 = vpop.f32.mrf.mxu1  ;;  %v560_v15 = vmul.f32 0.2, %v451_v3  ;;  %v576_v16 = vmul.f32 0.2, %v491_v4 }
  0xa3   :  { %v529_v7 = vmul.f32 0.2, %v373_v5  ;;  %v545_v8 = vmul.f32 0.2, %v413_v6 }
  0xa4   :  { %v624_v23 = vmax.f32 %v451_v3, %v560_v15  ;;  %v640_v24 = vmax.f32 %v491_v4, %v576_v16 }
  0xa5   :  { %v593_v11 = vmax.f32 %v373_v5, %v529_v7  ;;  %v609_v12 = vmax.f32 %v413_v6, %v545_v8 }
  0xa7   :  { %v1001_v13 = vpack.c.bf16 %v593_v11, %v592_v9  ;;  %v1041_v14 = vpack.c.bf16 %v609_v12, %v608_v10 }
  0xa9   :  { %1153 = vst [vmem:[%s1443_s2 + $0x8] sm:$0xff] %v1001_v13   ;;  %v453_v17 = vpop.f32.mrf.mxu2  ;;  %v493_v18 = vpop.f32.mrf.mxu3 }
  0xaa   :  { %1161 = vst [vmem:[%s1443_s2 + $0x48] sm:$0xff] %v1041_v14   ;;  %v561_v19 = vmul.f32 0.2, %v453_v17  ;;  %v577_v20 = vmul.f32 0.2, %v493_v18  ;;  %v376_v21 = vpop.f32.mrf.mxu0  ;;  %v416_v22 = vpop.f32.mrf.mxu1 }
  0xab   :  { %v530_v29 = vmul.f32 0.2, %v376_v21  ;;  %v546_v30 = vmul.f32 0.2, %v416_v22 }
  0xac   :  { %v625_v25 = vmax.f32 %v453_v17, %v561_v19  ;;  %v641_v26 = vmax.f32 %v493_v18, %v577_v20 }
  0xad   :  { %v594_v37 = vmax.f32 %v376_v21, %v530_v29  ;;  %v610_v38 = vmax.f32 %v416_v22, %v546_v30 }
  0xae   :  { %v1081_v27 = vpack.c.bf16 %v625_v25, %v624_v23  ;;  %v1121_v28 = vpack.c.bf16 %v641_v26, %v640_v24 }
  0xb0   :  { %1169 = vst [vmem:[%s1443_s2 + $0x88] sm:$0xff] %v1081_v27  }
  0xb1   :  { %1177 = vst [vmem:[%s1443_s2 + $0xc8] sm:$0xff] %v1121_v28   ;;  %v456_v31 = vpop.f32.mrf.mxu2  ;;  %v496_v32 = vpop.f32.mrf.mxu3 }
  0xb2   :  { %v378_v33 = vpop.f32.mrf.mxu0  ;;  %v418_v34 = vpop.f32.mrf.mxu1  ;;  %v562_v43 = vmul.f32 0.2, %v456_v31  ;;  %v578_v44 = vmul.f32 0.2, %v496_v32 }
  0xb3   :  { %v531_v35 = vmul.f32 0.2, %v378_v33  ;;  %v547_v36 = vmul.f32 0.2, %v418_v34 }
  0xb4   :  { %v626_v51 = vmax.f32 %v456_v31, %v562_v43  ;;  %v642_v52 = vmax.f32 %v496_v32, %v578_v44 }
  0xb5   :  { %v595_v39 = vmax.f32 %v378_v33, %v531_v35  ;;  %v611_v40 = vmax.f32 %v418_v34, %v547_v36 }
  0xb7   :  { %v1006_v41 = vpack.c.bf16 %v595_v39, %v594_v37  ;;  %v1046_v42 = vpack.c.bf16 %v611_v40, %v610_v38 }
  0xb9   :  { %1154 = vst [vmem:[%s1443_s2 + $0x10] sm:$0xff] %v1006_v41   ;;  %v458_v45 = vpop.f32.mrf.mxu2  ;;  %v498_v46 = vpop.f32.mrf.mxu3 }
  0xba   :  { %1162 = vst [vmem:[%s1443_s2 + $0x50] sm:$0xff] %v1046_v42   ;;  %v563_v47 = vmul.f32 0.2, %v458_v45  ;;  %v579_v48 = vmul.f32 0.2, %v498_v46  ;;  %v381_v49 = vpop.f32.mrf.mxu0  ;;  %v421_v50 = vpop.f32.mrf.mxu1 }
  0xbb   :  { %v532_v57 = vmul.f32 0.2, %v381_v49  ;;  %v548_v58 = vmul.f32 0.2, %v421_v50 }
  0xbc   :  { %v627_v53 = vmax.f32 %v458_v45, %v563_v47  ;;  %v643_v54 = vmax.f32 %v498_v46, %v579_v48 }
  0xbd   :  { %v596_v1 = vmax.f32 %v381_v49, %v532_v57  ;;  %v612_v2 = vmax.f32 %v421_v50, %v548_v58 }
  0xbe   :  { %v1086_v55 = vpack.c.bf16 %v627_v53, %v626_v51  ;;  %v1126_v56 = vpack.c.bf16 %v643_v54, %v642_v52 }
  0xc0   :  { %1170 = vst [vmem:[%s1443_s2 + $0x90] sm:$0xff] %v1086_v55  }
  0xc1   :  { %1178 = vst [vmem:[%s1443_s2 + $0xd0] sm:$0xff] %v1126_v56   ;;  %v461_v59 = vpop.f32.mrf.mxu2  ;;  %v501_v60 = vpop.f32.mrf.mxu3 }
  0xc2   :  { %v383_v61 = vpop.f32.mrf.mxu0  ;;  %v423_v62 = vpop.f32.mrf.mxu1  ;;  %v564_v7 = vmul.f32 0.2, %v461_v59  ;;  %v580_v8 = vmul.f32 0.2, %v501_v60 }
  0xc3   :  { %v533_v63 = vmul.f32 0.2, %v383_v61  ;;  %v549_v0 = vmul.f32 0.2, %v423_v62 }
  0xc4   :  { %v628_v15 = vmax.f32 %v461_v59, %v564_v7  ;;  %v644_v16 = vmax.f32 %v501_v60, %v580_v8 }
  0xc5   :  { %v597_v3 = vmax.f32 %v383_v61, %v533_v63  ;;  %v613_v4 = vmax.f32 %v423_v62, %v549_v0 }
  0xc7   :  { %v1011_v5 = vpack.c.bf16 %v597_v3, %v596_v1  ;;  %v1051_v6 = vpack.c.bf16 %v613_v4, %v612_v2 }
  0xc9   :  { %1155 = vst [vmem:[%s1443_s2 + $0x18] sm:$0xff] %v1011_v5   ;;  %v463_v9 = vpop.f32.mrf.mxu2  ;;  %v503_v10 = vpop.f32.mrf.mxu3 }
  0xca   :  { %1163 = vst [vmem:[%s1443_s2 + $0x58] sm:$0xff] %v1051_v6   ;;  %v565_v11 = vmul.f32 0.2, %v463_v9  ;;  %v581_v12 = vmul.f32 0.2, %v503_v10  ;;  %v386_v13 = vpop.f32.mrf.mxu0  ;;  %v426_v14 = vpop.f32.mrf.mxu1 }
  0xcb   :  { %v534_v21 = vmul.f32 0.2, %v386_v13  ;;  %v550_v22 = vmul.f32 0.2, %v426_v14 }
  0xcc   :  { %v629_v17 = vmax.f32 %v463_v9, %v565_v11  ;;  %v645_v18 = vmax.f32 %v503_v10, %v581_v12 }
  0xcd   :  { %v598_v29 = vmax.f32 %v386_v13, %v534_v21  ;;  %v614_v30 = vmax.f32 %v426_v14, %v550_v22 }
  0xce   :  { %v1091_v19 = vpack.c.bf16 %v629_v17, %v628_v15  ;;  %v1131_v20 = vpack.c.bf16 %v645_v18, %v644_v16 }
  0xd0   :  { %1171 = vst [vmem:[%s1443_s2 + $0x98] sm:$0xff] %v1091_v19  }
  0xd1   :  { %1179 = vst [vmem:[%s1443_s2 + $0xd8] sm:$0xff] %v1131_v20   ;;  %v466_v23 = vpop.f32.mrf.mxu2  ;;  %v506_v24 = vpop.f32.mrf.mxu3 }
  0xd2   :  { %v388_v25 = vpop.f32.mrf.mxu0  ;;  %v428_v26 = vpop.f32.mrf.mxu1  ;;  %v566_v35 = vmul.f32 0.2, %v466_v23  ;;  %v582_v36 = vmul.f32 0.2, %v506_v24 }
  0xd3   :  { %v535_v27 = vmul.f32 0.2, %v388_v25  ;;  %v551_v28 = vmul.f32 0.2, %v428_v26 }
  0xd4   :  { %v630_v43 = vmax.f32 %v466_v23, %v566_v35  ;;  %v646_v44 = vmax.f32 %v506_v24, %v582_v36 }
  0xd5   :  { %v599_v31 = vmax.f32 %v388_v25, %v535_v27  ;;  %v615_v32 = vmax.f32 %v428_v26, %v551_v28 }
  0xd7   :  { %v1016_v33 = vpack.c.bf16 %v599_v31, %v598_v29  ;;  %v1056_v34 = vpack.c.bf16 %v615_v32, %v614_v30 }
  0xd9   :  { %1156 = vst [vmem:[%s1443_s2 + $0x20] sm:$0xff] %v1016_v33   ;;  %v468_v37 = vpop.f32.mrf.mxu2  ;;  %v508_v38 = vpop.f32.mrf.mxu3 }
  0xda   :  { %1164 = vst [vmem:[%s1443_s2 + $0x60] sm:$0xff] %v1056_v34   ;;  %v567_v39 = vmul.f32 0.2, %v468_v37  ;;  %v583_v40 = vmul.f32 0.2, %v508_v38  ;;  %v391_v41 = vpop.f32.mrf.mxu0  ;;  %v431_v42 = vpop.f32.mrf.mxu1 }
  0xdb   :  { %v536_v49 = vmul.f32 0.2, %v391_v41  ;;  %v552_v50 = vmul.f32 0.2, %v431_v42 }
  0xdc   :  { %v631_v45 = vmax.f32 %v468_v37, %v567_v39  ;;  %v647_v46 = vmax.f32 %v508_v38, %v583_v40 }
  0xdd   :  { %v600_v57 = vmax.f32 %v391_v41, %v536_v49  ;;  %v616_v58 = vmax.f32 %v431_v42, %v552_v50 }
  0xde   :  { %v1096_v47 = vpack.c.bf16 %v631_v45, %v630_v43  ;;  %v1136_v48 = vpack.c.bf16 %v647_v46, %v646_v44 }
  0xe0   :  { %1172 = vst [vmem:[%s1443_s2 + $0xa0] sm:$0xff] %v1096_v47  }
  0xe1   :  { %1180 = vst [vmem:[%s1443_s2 + $0xe0] sm:$0xff] %v1136_v48   ;;  %v471_v51 = vpop.f32.mrf.mxu2  ;;  %v511_v52 = vpop.f32.mrf.mxu3 }
  0xe2   :  { %v393_v53 = vpop.f32.mrf.mxu0  ;;  %v433_v54 = vpop.f32.mrf.mxu1  ;;  %v568_v63 = vmul.f32 0.2, %v471_v51  ;;  %v584_v0 = vmul.f32 0.2, %v511_v52 }
  0xe3   :  { %v537_v55 = vmul.f32 0.2, %v393_v53  ;;  %v553_v56 = vmul.f32 0.2, %v433_v54 }
  0xe4   :  { %v632_v7 = vmax.f32 %v471_v51, %v568_v63  ;;  %v648_v8 = vmax.f32 %v511_v52, %v584_v0 }
  0xe5   :  { %v601_v59 = vmax.f32 %v393_v53, %v537_v55  ;;  %v617_v60 = vmax.f32 %v433_v54, %v553_v56 }
  0xe7   :  { %v1021_v61 = vpack.c.bf16 %v601_v59, %v600_v57  ;;  %v1061_v62 = vpack.c.bf16 %v617_v60, %v616_v58 }
  0xe9   :  { %1157 = vst [vmem:[%s1443_s2 + $0x28] sm:$0xff] %v1021_v61   ;;  %v473_v1 = vpop.f32.mrf.mxu2  ;;  %v513_v2 = vpop.f32.mrf.mxu3 }
  0xea   :  { %1165 = vst [vmem:[%s1443_s2 + $0x68] sm:$0xff] %v1061_v62   ;;  %v569_v3 = vmul.f32 0.2, %v473_v1  ;;  %v585_v4 = vmul.f32 0.2, %v513_v2  ;;  %v396_v5 = vpop.f32.mrf.mxu0  ;;  %v436_v6 = vpop.f32.mrf.mxu1 }
  0xeb   :  { %v538_v13 = vmul.f32 0.2, %v396_v5  ;;  %v554_v14 = vmul.f32 0.2, %v436_v6 }
  0xec   :  { %v633_v9 = vmax.f32 %v473_v1, %v569_v3  ;;  %v649_v10 = vmax.f32 %v513_v2, %v585_v4 }
  0xed   :  { %v602_v21 = vmax.f32 %v396_v5, %v538_v13  ;;  %v618_v22 = vmax.f32 %v436_v6, %v554_v14 }
  0xee   :  { %v1101_v11 = vpack.c.bf16 %v633_v9, %v632_v7  ;;  %v1141_v12 = vpack.c.bf16 %v649_v10, %v648_v8 }
  0xf0   :  { %1173 = vst [vmem:[%s1443_s2 + $0xa8] sm:$0xff] %v1101_v11  }
  0xf1   :  { %1181 = vst [vmem:[%s1443_s2 + $0xe8] sm:$0xff] %v1141_v12   ;;  %v476_v15 = vpop.f32.mrf.mxu2  ;;  %v516_v16 = vpop.f32.mrf.mxu3 }
  0xf2   :  { %v398_v17 = vpop.f32.mrf.mxu0  ;;  %v438_v18 = vpop.f32.mrf.mxu1  ;;  %v570_v27 = vmul.f32 0.2, %v476_v15  ;;  %v586_v28 = vmul.f32 0.2, %v516_v16 }
  0xf3   :  { %v539_v19 = vmul.f32 0.2, %v398_v17  ;;  %v555_v20 = vmul.f32 0.2, %v438_v18 }
  0xf4   :  { %v634_v35 = vmax.f32 %v476_v15, %v570_v27  ;;  %v650_v36 = vmax.f32 %v516_v16, %v586_v28 }
  0xf5   :  { %v603_v23 = vmax.f32 %v398_v17, %v539_v19  ;;  %v619_v24 = vmax.f32 %v438_v18, %v555_v20 }
  0xf7   :  { %v1026_v25 = vpack.c.bf16 %v603_v23, %v602_v21  ;;  %v1066_v26 = vpack.c.bf16 %v619_v24, %v618_v22 }
  0xf9   :  { %1158 = vst [vmem:[%s1443_s2 + $0x30] sm:$0xff] %v1026_v25   ;;  %v478_v29 = vpop.f32.mrf.mxu2  ;;  %v518_v30 = vpop.f32.mrf.mxu3 }
  0xfa   :  { %1166 = vst [vmem:[%s1443_s2 + $0x70] sm:$0xff] %v1066_v26   ;;  %v571_v31 = vmul.f32 0.2, %v478_v29  ;;  %v587_v32 = vmul.f32 0.2, %v518_v30  ;;  %v401_v33 = vpop.f32.mrf.mxu0  ;;  %v441_v34 = vpop.f32.mrf.mxu1 }
  0xfb   :  { %v540_v41 = vmul.f32 0.2, %v401_v33  ;;  %v556_v42 = vmul.f32 0.2, %v441_v34 }
  0xfc   :  { %v635_v37 = vmax.f32 %v478_v29, %v571_v31  ;;  %v651_v38 = vmax.f32 %v518_v30, %v587_v32 }
  0xfd   :  { %v604_v49 = vmax.f32 %v401_v33, %v540_v41  ;;  %v620_v50 = vmax.f32 %v441_v34, %v556_v42 }
  0xfe   :  { %v1106_v39 = vpack.c.bf16 %v635_v37, %v634_v35  ;;  %v1146_v40 = vpack.c.bf16 %v651_v38, %v650_v36 }
 0x100   :  { %1174 = vst [vmem:[%s1443_s2 + $0xb0] sm:$0xff] %v1106_v39  }
 0x101   :  { %1182 = vst [vmem:[%s1443_s2 + $0xf0] sm:$0xff] %v1146_v40   ;;  %v481_v43 = vpop.f32.mrf.mxu2  ;;  %v521_v44 = vpop.f32.mrf.mxu3 }
 0x102   :  { %v403_v45 = vpop.f32.mrf.mxu0  ;;  %v443_v46 = vpop.f32.mrf.mxu1  ;;  %v572_v55 = vmul.f32 0.2, %v481_v43  ;;  %v588_v56 = vmul.f32 0.2, %v521_v44 }
 0x103   :  { %v541_v47 = vmul.f32 0.2, %v403_v45  ;;  %v557_v48 = vmul.f32 0.2, %v443_v46 }
 0x104   :  { %v636_v61 = vmax.f32 %v481_v43, %v572_v55  ;;  %v652_v62 = vmax.f32 %v521_v44, %v588_v56 }
 0x105   :  { %v605_v51 = vmax.f32 %v403_v45, %v541_v47  ;;  %v621_v52 = vmax.f32 %v443_v46, %v557_v48 }
 0x107   :  { %v1031_v53 = vpack.c.bf16 %v605_v51, %v604_v49  ;;  %v1071_v54 = vpack.c.bf16 %v621_v52, %v620_v50 }
 0x109   :  { %1159 = vst [vmem:[%s1443_s2 + $0x38] sm:$0xff] %v1031_v53   ;;  %v483_v57 = vpop.f32.mrf.mxu2  ;;  %v523_v58 = vpop.f32.mrf.mxu3 }
 0x10a   :  { %1167 = vst [vmem:[%s1443_s2 + $0x78] sm:$0xff] %v1071_v54   ;;  %v573_v59 = vmul.f32 0.2, %v483_v57  ;;  %v589_v60 = vmul.f32 0.2, %v523_v58 }
 0x10c   :  { %v637_v63 = vmax.f32 %v483_v57, %v573_v59  ;;  %v653_v0 = vmax.f32 %v523_v58, %v589_v60 }
 0x10e   :  { %v1111_v1 = vpack.c.bf16 %v637_v63, %v636_v61  ;;  %v1151_v2 = vpack.c.bf16 %v653_v0, %v652_v62 }
 0x110   :  { %1175 = vst [vmem:[%s1443_s2 + $0xb8] sm:$0xff] %v1111_v1  }
 0x111   :  { %1183 = vst [vmem:[%s1443_s2 + $0xf8] sm:$0xff] %v1151_v2  }

// kernel: _lambda_.7
= control target key start
LH: loop header
LB: loop body
LE: loop exit
PB: predicated region body
PF: predicated region fallthrough
CT: control target
= control target key end

     0   :  { %s352_s0 = inlined_call_operand.vmem [shape: bf16[128,128], index: 0, kind: input, shape index: {}]   ;;  %s353_s1 = inlined_call_operand.vmem [shape: f32[1,128], index: 1, kind: input, shape index: {}]   ;;  %s354_s2 = inlined_call_operand.vmem [shape: f32[1,128], index: 2, kind: input, shape index: {}]   ;;  %s355_s3 = inlined_call_operand.vmem [shape: bf16[128,128], index: 3, kind: output, shape index: {}]  }
   0x1   :  { %v155_v0 = vld [vmem:[%s352_s0] sm:$0xff]   ;;  %v226_v5 = vld [vmem:[%s352_s0 + $0x8] sm:$0xff]   ;;  %v227_v8 = vld [vmem:[%s352_s0 + $0x10] sm:$0xff]  }
   0x2   :  { %v268_v1 = vld [vmem:[%s353_s1] ss:$0 sm:$0xff]  ;;  %v156_v2 = vunpack.c.l.bf16 %v155_v0  ;;  %v157_v3 = vunpack.c.h.bf16 %v155_v0  ;;  %v160_v6 = vunpack.c.l.bf16 %v226_v5  ;;  %v161_v7 = vunpack.c.h.bf16 %v226_v5  ;;  %v228_v9 = vld [vmem:[%s352_s0 + $0x18] sm:$0xff]   ;;  %v230_v43 = vld [vmem:[%s352_s0 + $0x28] sm:$0xff]  }
   0x3   :  { %v273_v4 = vld [vmem:[%s354_s2] ss:$0 sm:$0xff]  ;;  %v164_v12 = vunpack.c.l.bf16 %v227_v8  ;;  %v165_v13 = vunpack.c.h.bf16 %v227_v8  ;;  %v168_v16 = vunpack.c.l.bf16 %v228_v9  ;;  %v169_v17 = vunpack.c.h.bf16 %v228_v9  ;;  %v231_v48 = vld [vmem:[%s352_s0 + $0x30] sm:$0xff]   ;;  %v232_v53 = vld [vmem:[%s352_s0 + $0x38] sm:$0xff]  }
   0x4   :  { %v50_v10 = vmul.f32 %v268_v1, %v156_v2  ;;  %v51_v11 = vmul.f32 %v268_v1, %v157_v3  ;;  %v52_v14 = vmul.f32 %v268_v1, %v160_v6  ;;  %v53_v15 = vmul.f32 %v268_v1, %v161_v7  ;;  %v229_v34 = vld [vmem:[%s352_s0 + $0x20] sm:$0xff]  }
   0x5   :  { %v54_v20 = vmul.f32 %v268_v1, %v164_v12  ;;  %v55_v21 = vmul.f32 %v268_v1, %v165_v13  ;;  %v56_v24 = vmul.f32 %v268_v1, %v168_v16  ;;  %v57_v25 = vmul.f32 %v268_v1, %v169_v17 }
   0x6   :  { %v70_v18 = vadd.f32 %v273_v4, %v50_v10  ;;  %v71_v19 = vadd.f32 %v273_v4, %v51_v11  ;;  %v72_v22 = vadd.f32 %v273_v4, %v52_v14  ;;  %v73_v23 = vadd.f32 %v273_v4, %v53_v15 }
   0x7   :  { %v74_v28 = vadd.f32 %v273_v4, %v54_v20  ;;  %v75_v29 = vadd.f32 %v273_v4, %v55_v21  ;;  %v76_v32 = vadd.f32 %v273_v4, %v56_v24  ;;  %v77_v33 = vadd.f32 %v273_v4, %v57_v25 }
   0x8   :  { %v86_v26 = vmul.f32 0.2, %v70_v18  ;;  %v87_v27 = vmul.f32 0.2, %v71_v19  ;;  %v88_v30 = vmul.f32 0.2, %v72_v22  ;;  %v172_v47 = vunpack.c.l.bf16 %v229_v34 }
   0x9   :  { %v89_v31 = vmul.f32 0.2, %v73_v23  ;;  %v90_v37 = vmul.f32 0.2, %v74_v28  ;;  %v91_v38 = vmul.f32 0.2, %v75_v29  ;;  %v173_v52 = vunpack.c.h.bf16 %v229_v34 }
   0xa   :  { %v102_v35 = vmax.f32 %v70_v18, %v86_v26  ;;  %v103_v36 = vmax.f32 %v71_v19, %v87_v27  ;;  %v104_v39 = vmax.f32 %v72_v22, %v88_v30  ;;  %v92_v41 = vmul.f32 0.2, %v76_v32 }
   0xb   :  { %v105_v40 = vmax.f32 %v73_v23, %v89_v31  ;;  %v93_v42 = vmul.f32 0.2, %v77_v33  ;;  %v106_v45 = vmax.f32 %v74_v28, %v90_v37  ;;  %v107_v46 = vmax.f32 %v75_v29, %v91_v38 }
   0xc   :  { %v189_v44 = vpack.c.bf16 %v103_v36, %v102_v35  ;;  %v108_v50 = vmax.f32 %v76_v32, %v92_v41  ;;  %v58_v55 = vmul.f32 %v268_v1, %v172_v47  ;;  %v176_v56 = vunpack.c.l.bf16 %v230_v43 }
   0xd   :  { %v194_v49 = vpack.c.bf16 %v105_v40, %v104_v39  ;;  %v109_v51 = vmax.f32 %v77_v33, %v93_v42  ;;  %v199_v54 = vpack.c.bf16 %v107_v46, %v106_v45  ;;  %v177_v57 = vunpack.c.h.bf16 %v230_v43 }
   0xe   :  { %190 = vst [vmem:[%s355_s3] sm:$0xff] %v189_v44   ;;  %v59_v59 = vmul.f32 %v268_v1, %v173_v52  ;;  %v180_v60 = vunpack.c.l.bf16 %v231_v48  ;;  %v181_v61 = vunpack.c.h.bf16 %v231_v48  ;;  %v78_v62 = vadd.f32 %v273_v4, %v58_v55 }
   0xf   :  { %233 = vst [vmem:[%s355_s3 + $0x8] sm:$0xff] %v194_v49   ;;  %v204_v58 = vpack.c.bf16 %v109_v51, %v108_v50  ;;  %v60_v63 = vmul.f32 %v268_v1, %v176_v56  ;;  %v61_v0 = vmul.f32 %v268_v1, %v177_v57  ;;  %v184_v2 = vunpack.c.l.bf16 %v232_v53 }
  0x10   :  { %234 = vst [vmem:[%s355_s3 + $0x10] sm:$0xff] %v199_v54   ;;  %v79_v3 = vadd.f32 %v273_v4, %v59_v59  ;;  %v62_v5 = vmul.f32 %v268_v1, %v180_v60  ;;  %v63_v6 = vmul.f32 %v268_v1, %v181_v61  ;;  %v185_v7 = vunpack.c.h.bf16 %v232_v53 }
  0x11   :  { %235 = vst [vmem:[%s355_s3 + $0x18] sm:$0xff] %v204_v58   ;;  %v94_v8 = vmul.f32 0.2, %v78_v62  ;;  %v80_v9 = vadd.f32 %v273_v4, %v60_v63  ;;  %v81_v10 = vadd.f32 %v273_v4, %v61_v0  ;;  %v64_v11 = vmul.f32 %v268_v1, %v184_v2 }
  0x12   :  { %v95_v12 = vmul.f32 0.2, %v79_v3  ;;  %v82_v13 = vadd.f32 %v273_v4, %v62_v5  ;;  %v83_v14 = vadd.f32 %v273_v4, %v63_v6  ;;  %v65_v15 = vmul.f32 %v268_v1, %v185_v7 }
  0x13   :  { %v110_v16 = vmax.f32 %v78_v62, %v94_v8  ;;  %v96_v17 = vmul.f32 0.2, %v80_v9  ;;  %v97_v18 = vmul.f32 0.2, %v81_v10  ;;  %v84_v19 = vadd.f32 %v273_v4, %v64_v11 }
  0x14   :  { %v111_v20 = vmax.f32 %v79_v3, %v95_v12  ;;  %v98_v21 = vmul.f32 0.2, %v82_v13  ;;  %v99_v22 = vmul.f32 0.2, %v83_v14  ;;  %v85_v23 = vadd.f32 %v273_v4, %v65_v15 }
  0x15   :  { %v112_v24 = vmax.f32 %v80_v9, %v96_v17  ;;  %v113_v25 = vmax.f32 %v81_v10, %v97_v18  ;;  %v100_v26 = vmul.f32 0.2, %v84_v19 }
  0x16   :  { %v209_v27 = vpack.c.bf16 %v111_v20, %v110_v16  ;;  %v114_v28 = vmax.f32 %v82_v13, %v98_v21  ;;  %v115_v29 = vmax.f32 %v83_v14, %v99_v22  ;;  %v101_v30 = vmul.f32 0.2, %v85_v23 }
  0x17   :  { %v214_v31 = vpack.c.bf16 %v113_v25, %v112_v24  ;;  %v116_v32 = vmax.f32 %v84_v19, %v100_v26 }
  0x18   :  { %236 = vst [vmem:[%s355_s3 + $0x20] sm:$0xff] %v209_v27   ;;  %v219_v1 = vpack.c.bf16 %v115_v29, %v114_v28  ;;  %v117_v33 = vmax.f32 %v85_v23, %v101_v30 }
  0x19   :  { %237 = vst [vmem:[%s355_s3 + $0x28] sm:$0xff] %v214_v31  }
  0x1a   :  { %238 = vst [vmem:[%s355_s3 + $0x30] sm:$0xff] %v219_v1   ;;  %v224_v4 = vpack.c.bf16 %v117_v33, %v116_v32 }
  0x1c   :  { %239 = vst [vmem:[%s355_s3 + $0x38] sm:$0xff] %v224_v4  }

// kernel: _lambda_.6
= control target key start
LH: loop header
LB: loop body
LE: loop exit
PB: predicated region body
PF: predicated region fallthrough
CT: control target
= control target key end

     0   :  { %vm747_vm0 = vcmask 1040384   ;;  %s1472_s1 = inlined_call_operand.vmem [shape: bf16[512,128], index: 1, kind: input, shape index: {}]   ;;  %s1473_s0 = inlined_call_operand.vmem [shape: bf16[128,512], index: 0, kind: input, shape index: {}]   ;;  %s1474_s2 = inlined_call_operand.vmem [shape: bf16[128,128], index: 2, kind: output, shape index: {0}]   ;;  %s1475_s3 = inlined_call_operand.vmem [shape: f32[1,2,128], index: 3, kind: output, shape index: {1}]  }
   0x1   :  { %v1053_v0 = vld [vmem:[%s1472_s1 + $0x38] sm:$0xff]  ;;  %v1052_v4 = vld [vmem:[%s1472_s1 + $0x30] sm:$0xff]  ;;  %v1051_v8 = vld [vmem:[%s1472_s1 + $0x28] sm:$0xff] }
   0x2   :  { %v1061_v1 = vld [vmem:[%s1472_s1 + $0x78] sm:$0xff]  ;;  %461 = vmatpush.bf16.msra.mxu0 %v1053_v0  ;;  %v1060_v5 = vld [vmem:[%s1472_s1 + $0x70] sm:$0xff]  ;;  %v1059_v9 = vld [vmem:[%s1472_s1 + $0x68] sm:$0xff] }
   0x3   :  { %v1069_v2 = vld [vmem:[%s1472_s1 + $0xb8] sm:$0xff]  ;;  %510 = vmatpush.bf16.msra.mxu1 %v1061_v1  ;;  %v1068_v6 = vld [vmem:[%s1472_s1 + $0xb0] sm:$0xff]  ;;  %v1067_v10 = vld [vmem:[%s1472_s1 + $0xa8] sm:$0xff] }
   0x4   :  { %v1077_v3 = vld [vmem:[%s1472_s1 + $0xf8] sm:$0xff]  ;;  %559 = vmatpush.bf16.msra.mxu2 %v1069_v2  ;;  %v1076_v7 = vld [vmem:[%s1472_s1 + $0xf0] sm:$0xff]  ;;  %v1075_v11 = vld [vmem:[%s1472_s1 + $0xe8] sm:$0xff] }
   0x5   :  { %608 = vmatpush.bf16.msra.mxu3 %v1077_v3  ;;  %v1050_v12 = vld [vmem:[%s1472_s1 + $0x20] sm:$0xff]  ;;  %v1049_v16 = vld [vmem:[%s1472_s1 + $0x18] sm:$0xff]  ;;  %v1048_v20 = vld [vmem:[%s1472_s1 + $0x10] sm:$0xff] }
   0x6   :  { %462 = vmatpush.bf16.msra.mxu0 %v1052_v4  ;;  %v1058_v13 = vld [vmem:[%s1472_s1 + $0x60] sm:$0xff]  ;;  %v1057_v17 = vld [vmem:[%s1472_s1 + $0x58] sm:$0xff]  ;;  %v1056_v21 = vld [vmem:[%s1472_s1 + $0x50] sm:$0xff] }
   0x7   :  { %511 = vmatpush.bf16.msra.mxu1 %v1060_v5  ;;  %v1066_v14 = vld [vmem:[%s1472_s1 + $0xa0] sm:$0xff]  ;;  %v1065_v18 = vld [vmem:[%s1472_s1 + $0x98] sm:$0xff]  ;;  %v1064_v22 = vld [vmem:[%s1472_s1 + $0x90] sm:$0xff] }
   0x8   :  { %560 = vmatpush.bf16.msra.mxu2 %v1068_v6  ;;  %v1074_v15 = vld [vmem:[%s1472_s1 + $0xe0] sm:$0xff]  ;;  %v1073_v19 = vld [vmem:[%s1472_s1 + $0xd8] sm:$0xff]  ;;  %v1072_v23 = vld [vmem:[%s1472_s1 + $0xd0] sm:$0xff] }
   0x9   :  { %609 = vmatpush.bf16.msra.mxu3 %v1076_v7  ;;  %v1047_v24 = vld [vmem:[%s1472_s1 + $0x8] sm:$0xff]  ;;  %v1046_v28 = vld [vmem:[%s1472_s1] sm:$0xff]  ;;  %v1016_v33 = vld [vmem:[%s1473_s0 + $0xc] sm:$0xf0] }
   0xa   :  { %463 = vmatpush.bf16.msra.mxu0 %v1051_v8  ;;  %v1055_v25 = vld [vmem:[%s1472_s1 + $0x48] sm:$0xff]  ;;  %v1054_v29 = vld [vmem:[%s1472_s1 + $0x40] sm:$0xff]  ;;  %v762_v35 = vld [vmem:[%s1473_s0 + $0x10] sm:$0xf0] }
   0xb   :  { %512 = vmatpush.bf16.msra.mxu1 %v1059_v9  ;;  %v1063_v26 = vld [vmem:[%s1472_s1 + $0x88] sm:$0xff]  ;;  %v1062_v30 = vld [vmem:[%s1472_s1 + $0x80] sm:$0xff]  ;;  %v1017_v37 = vld [vmem:[%s1473_s0 + $0x14] sm:$0xf0] }
   0xc   :  { %561 = vmatpush.bf16.msra.mxu2 %v1067_v10  ;;  %v1071_v27 = vld [vmem:[%s1472_s1 + $0xc8] sm:$0xff]  ;;  %v1070_v31 = vld [vmem:[%s1472_s1 + $0xc0] sm:$0xff]  ;;  %v770_v39 = vld [vmem:[%s1473_s0 + $0x18] sm:$0xf0] }
   0xd   :  { %610 = vmatpush.bf16.msra.mxu3 %v1075_v11  ;;  %v760_v32 = vld [vmem:[%s1473_s0] sm:$0xf]  ;;  %v1014_v34 = vld [vmem:[%s1473_s0 + $0x4] sm:$0xf]  ;;  %v768_v36 = vld [vmem:[%s1473_s0 + $0x8] sm:$0xf] }
   0xe   :  { %464 = vmatpush.bf16.msra.mxu0 %v1050_v12  ;;  %v1015_v38 = vld [vmem:[%s1473_s0 + $0xc] sm:$0xf]  ;;  %v761_v40 = vor.u32 %v1016_v33, %v760_v32  ;;  %v765_v41 = vor.u32 %v1014_v34, %v762_v35  ;;  %v769_v42 = vor.u32 %v1017_v37, %v768_v36  ;;  %v776_v44 = vld [vmem:[%s1473_s0 + $0x20] sm:$0xf]  ;;  %v1020_v45 = vld [vmem:[%s1473_s0 + $0x2c] sm:$0xf0] }
   0xf   :  { %513 = vmatpush.bf16.msra.mxu1 %v1058_v13  ;;  %v773_v43 = vor.u32 %v1015_v38, %v770_v39  ;;  %v1018_v46 = vld [vmem:[%s1473_s0 + $0x24] sm:$0xf]  ;;  %v778_v47 = vld [vmem:[%s1473_s0 + $0x30] sm:$0xf0]  ;;  %v784_v48 = vld [vmem:[%s1473_s0 + $0x28] sm:$0xf]  ;;  %v777_v52 = vor.u32 %v1020_v45, %v776_v44 }
  0x10   :  { %562 = vmatpush.bf16.msra.mxu2 %v1066_v14  ;;  %v1021_v49 = vld [vmem:[%s1473_s0 + $0x34] sm:$0xf0]  ;;  %v1019_v50 = vld [vmem:[%s1473_s0 + $0x2c] sm:$0xf]  ;;  %v786_v51 = vld [vmem:[%s1473_s0 + $0x38] sm:$0xf0]  ;;  %v781_v53 = vor.u32 %v1018_v46, %v778_v47 }
  0x11   :  { %611 = vmatpush.bf16.msra.mxu3 %v1074_v15  ;;  %v785_v54 = vor.u32 %v1021_v49, %v784_v48  ;;  %v789_v55 = vor.u32 %v1019_v50, %v786_v51  ;;  %v792_v56 = vld [vmem:[%s1473_s0 + $0x40] sm:$0xf]  ;;  %v1024_v57 = vld [vmem:[%s1473_s0 + $0x4c] sm:$0xf0]  ;;  %v1022_v58 = vld [vmem:[%s1473_s0 + $0x44] sm:$0xf] }
  0x12   :  { %465 = vmatpush.bf16.msra.mxu0 %v1049_v16  ;;  %v794_v59 = vld [vmem:[%s1473_s0 + $0x50] sm:$0xf0]  ;;  %v800_v60 = vld [vmem:[%s1473_s0 + $0x48] sm:$0xf]  ;;  %v1025_v61 = vld [vmem:[%s1473_s0 + $0x54] sm:$0xf0]  ;;  %v793_v0 = vor.u32 %v1024_v57, %v792_v56 }
  0x13   :  { %514 = vmatpush.bf16.msra.mxu1 %v1057_v17  ;;  %v1023_v62 = vld [vmem:[%s1473_s0 + $0x4c] sm:$0xf]  ;;  %v802_v63 = vld [vmem:[%s1473_s0 + $0x58] sm:$0xf0]  ;;  %v797_v1 = vor.u32 %v1022_v58, %v794_v59  ;;  %v801_v2 = vor.u32 %v1025_v61, %v800_v60  ;;  %v808_v4 = vld [vmem:[%s1473_s0 + $0x60] sm:$0xf] }
  0x14   :  { %563 = vmatpush.bf16.msra.mxu2 %v1065_v18  ;;  %v805_v3 = vor.u32 %v1023_v62, %v802_v63  ;;  %v1028_v5 = vld [vmem:[%s1473_s0 + $0x6c] sm:$0xf0]  ;;  %v1026_v6 = vld [vmem:[%s1473_s0 + $0x64] sm:$0xf]  ;;  %v810_v7 = vld [vmem:[%s1473_s0 + $0x70] sm:$0xf0] }
  0x15   :  { %612 = vmatpush.bf16.msra.mxu3 %v1073_v19  ;;  %v816_v8 = vld [vmem:[%s1473_s0 + $0x68] sm:$0xf]  ;;  %v1029_v9 = vld [vmem:[%s1473_s0 + $0x74] sm:$0xf0]  ;;  %v1027_v10 = vld [vmem:[%s1473_s0 + $0x6c] sm:$0xf]  ;;  %v809_v12 = vor.u32 %v1028_v5, %v808_v4  ;;  %v813_v13 = vor.u32 %v1026_v6, %v810_v7 }
  0x16   :  { %466 = vmatpush.bf16.msra.mxu0 %v1048_v20  ;;  %v818_v11 = vld [vmem:[%s1473_s0 + $0x78] sm:$0xf0]  ;;  %v817_v14 = vor.u32 %v1029_v9, %v816_v8  ;;  %v824_v16 = vld [vmem:[%s1473_s0 + $0x80] sm:$0xf]  ;;  %v1032_v17 = vld [vmem:[%s1473_s0 + $0x8c] sm:$0xf0] }
  0x17   :  { %515 = vmatpush.bf16.msra.mxu1 %v1056_v21  ;;  %v821_v15 = vor.u32 %v1027_v10, %v818_v11  ;;  %v1030_v18 = vld [vmem:[%s1473_s0 + $0x84] sm:$0xf]  ;;  %v826_v19 = vld [vmem:[%s1473_s0 + $0x90] sm:$0xf0]  ;;  %v832_v20 = vld [vmem:[%s1473_s0 + $0x88] sm:$0xf] }
  0x18   :  { %564 = vmatpush.bf16.msra.mxu2 %v1064_v22  ;;  %v1033_v21 = vld [vmem:[%s1473_s0 + $0x94] sm:$0xf0]  ;;  %v1031_v22 = vld [vmem:[%s1473_s0 + $0x8c] sm:$0xf]  ;;  %v848_v32 = vld [vmem:[%s1473_s0 + $0xa8] sm:$0xf] }
  0x19   :  { %613 = vmatpush.bf16.msra.mxu3 %v1072_v23  ;;  %v834_v23 = vld [vmem:[%s1473_s0 + $0x98] sm:$0xf0]  ;;  %v1037_v33 = vld [vmem:[%s1473_s0 + $0xb4] sm:$0xf0]  ;;  %v1035_v34 = vld [vmem:[%s1473_s0 + $0xac] sm:$0xf] }
  0x1a   :  { %467 = vmatpush.bf16.msra.mxu0 %v1047_v24  ;;  %v825_v24 = vor.u32 %v1032_v17, %v824_v16  ;;  %v850_v35 = vld [vmem:[%s1473_s0 + $0xb8] sm:$0xf0]  ;;  %v849_v38 = vor.u32 %v1037_v33, %v848_v32  ;;  %v864_v44 = vld [vmem:[%s1473_s0 + $0xc8] sm:$0xf]  ;;  %v1041_v45 = vld [vmem:[%s1473_s0 + $0xd4] sm:$0xf0] }
  0x1b   :  { %516 = vmatpush.bf16.msra.mxu1 %v1055_v25  ;;  %v829_v25 = vor.u32 %v1030_v18, %v826_v19  ;;  %v853_v39 = vor.u32 %v1035_v34, %v850_v35  ;;  %v1039_v46 = vld [vmem:[%s1473_s0 + $0xcc] sm:$0xf]  ;;  %v866_v47 = vld [vmem:[%s1473_s0 + $0xd8] sm:$0xf0]  ;;  %v865_v50 = vor.u32 %v1041_v45, %v864_v44  ;;  %v880_v56 = vld [vmem:[%s1473_s0 + $0xe8] sm:$0xf] }
  0x1c   :  { %565 = vmatpush.bf16.msra.mxu2 %v1063_v26  ;;  %v833_v26 = vor.u32 %v1033_v21, %v832_v20  ;;  %v869_v51 = vor.u32 %v1039_v46, %v866_v47  ;;  %v1045_v57 = vld [vmem:[%s1473_s0 + $0xf4] sm:$0xf0]  ;;  %v1043_v58 = vld [vmem:[%s1473_s0 + $0xec] sm:$0xf]  ;;  %v882_v59 = vld [vmem:[%s1473_s0 + $0xf8] sm:$0xf0] }
  0x1d   :  { %614 = vmatpush.bf16.msra.mxu3 %v1071_v27  ;;  %v837_v27 = vor.u32 %v1031_v22, %v834_v23  ;;  %v881_v62 = vor.u32 %v1045_v57, %v880_v56  ;;  %v885_v63 = vor.u32 %v1043_v58, %v882_v59 }
  0x1e   :  { %468 = vmatpush.bf16.msra.mxu0 %v1046_v28  ;;  %v840_v28 = vld [vmem:[%s1473_s0 + $0xa0] sm:$0xf] }
  0x1f   :  { %517 = vmatpush.bf16.msra.mxu1 %v1054_v29  ;;  %v1036_v29 = vld [vmem:[%s1473_s0 + $0xac] sm:$0xf0] }
  0x20   :  { %566 = vmatpush.bf16.msra.mxu2 %v1062_v30  ;;  %v1034_v30 = vld [vmem:[%s1473_s0 + $0xa4] sm:$0xf]  ;;  %v841_v36 = vor.u32 %v1036_v29, %v840_v28 }
  0x21   :  { %615 = vmatpush.bf16.msra.mxu3 %v1070_v31  ;;  %469 = vmatmul.bf16.vlgmr.msra.gmra.mxu0 %v761_v40  ;;  %v842_v31 = vld [vmem:[%s1473_s0 + $0xb0] sm:$0xf0]  ;;  %v856_v40 = vld [vmem:[%s1473_s0 + $0xc0] sm:$0xf] }
  0x22   :  { %518 = vmatmul.bf16.vlgmr.msra.gmra.mxu1 %v765_v41  ;;  %v845_v37 = vor.u32 %v1034_v30, %v842_v31  ;;  %v1040_v41 = vld [vmem:[%s1473_s0 + $0xcc] sm:$0xf0] }
  0x23   :  { %567 = vmatmul.bf16.vlgmr.msra.gmra.mxu2 %v769_v42  ;;  %v1038_v42 = vld [vmem:[%s1473_s0 + $0xc4] sm:$0xf]  ;;  %v857_v48 = vor.u32 %v1040_v41, %v856_v40 }
  0x24   :  { %616 = vmatmul.bf16.vlgmr.msra.gmra.mxu3 %v773_v43  ;;  %v858_v43 = vld [vmem:[%s1473_s0 + $0xd0] sm:$0xf0] }
  0x25   :  { %v861_v49 = vor.u32 %v1038_v42, %v858_v43 }
  0x31   :  { %474 = vmatmul.bf16.gmra.mxu0 %v777_v52  ;;  %v872_v52 = vld [vmem:[%s1473_s0 + $0xe0] sm:$0xf] }
  0x32   :  { %523 = vmatmul.bf16.gmra.mxu1 %v781_v53  ;;  %v1044_v53 = vld [vmem:[%s1473_s0 + $0xec] sm:$0xf0] }
  0x33   :  { %572 = vmatmul.bf16.gmra.mxu2 %v785_v54  ;;  %v1042_v54 = vld [vmem:[%s1473_s0 + $0xe4] sm:$0xf]  ;;  %v873_v60 = vor.u32 %v1044_v53, %v872_v52 }
  0x34   :  { %621 = vmatmul.bf16.gmra.mxu3 %v789_v55  ;;  %v874_v55 = vld [vmem:[%s1473_s0 + $0xf0] sm:$0xf0] }
  0x35   :  { %v877_v61 = vor.u32 %v1042_v54, %v874_v55 }
  0x41   :  { %479 = vmatmul.bf16.gmra.mxu0 %v793_v0 }
  0x42   :  { %528 = vmatmul.bf16.gmra.mxu1 %v797_v1 }
  0x43   :  { %577 = vmatmul.bf16.gmra.mxu2 %v801_v2 }
  0x44   :  { %626 = vmatmul.bf16.gmra.mxu3 %v805_v3 }
  0x51   :  { %484 = vmatmul.bf16.gmra.mxu0 %v809_v12 }
  0x52   :  { %533 = vmatmul.bf16.gmra.mxu1 %v813_v13 }
  0x53   :  { %582 = vmatmul.bf16.gmra.mxu2 %v817_v14 }
  0x54   :  { %631 = vmatmul.bf16.gmra.mxu3 %v821_v15 }
  0x61   :  { %489 = vmatmul.bf16.gmra.mxu0 %v825_v24 }
  0x62   :  { %538 = vmatmul.bf16.gmra.mxu1 %v829_v25 }
  0x63   :  { %587 = vmatmul.bf16.gmra.mxu2 %v833_v26 }
  0x64   :  { %636 = vmatmul.bf16.gmra.mxu3 %v837_v27 }
  0x71   :  { %494 = vmatmul.bf16.gmra.mxu0 %v841_v36 }
  0x72   :  { %543 = vmatmul.bf16.gmra.mxu1 %v845_v37 }
  0x73   :  { %592 = vmatmul.bf16.gmra.mxu2 %v849_v38 }
  0x74   :  { %641 = vmatmul.bf16.gmra.mxu3 %v853_v39 }
  0x81   :  { %499 = vmatmul.bf16.gmra.mxu0 %v857_v48 }
  0x82   :  { %548 = vmatmul.bf16.gmra.mxu1 %v861_v49 }
  0x83   :  { %597 = vmatmul.bf16.gmra.mxu2 %v865_v50 }
  0x84   :  { %646 = vmatmul.bf16.gmra.mxu3 %v869_v51 }
  0x91   :  { %504 = vmatmul.bf16.gmra.mxu0 %v873_v60 }
  0x92   :  { %553 = vmatmul.bf16.gmra.mxu1 %v877_v61 }
  0x93   :  { %602 = vmatmul.bf16.gmra.mxu2 %v881_v62 }
  0x94   :  { %651 = vmatmul.bf16.gmra.mxu3 %v885_v63 }
  0x9e   :  { %v470_v0 = vpop.f32.mrf.mxu0 }
  0x9f   :  { %v519_v1 = vpop.f32.mrf.mxu1 }
  0xa0   :  { %v520_v2 = vadd.f32 %v519_v1, %v470_v0 }
  0xa6   :  { %v568_v3 = vpop.f32.mrf.mxu2  ;;  %v472_v5 = vpop.f32.mrf.mxu0 }
  0xa7   :  { %v617_v4 = vpop.f32.mrf.mxu3  ;;  %v521_v6 = vpop.f32.mrf.mxu1  ;;  %v569_v7 = vadd.f32 %v568_v3, %v520_v2 }
  0xa8   :  { %v522_v8 = vadd.f32 %v521_v6, %v472_v5 }
  0xa9   :  { %v618_v9 = vadd.f32 %v617_v4, %v569_v7 }
  0xab   :  { %v710_v16 = vmul.f32 %v618_v9, %v618_v9 }
  0xae   :  { %v570_v10 = vpop.f32.mrf.mxu2  ;;  %v475_v13 = vpop.f32.mrf.mxu0 }
  0xaf   :  { %v619_v11 = vpop.f32.mrf.mxu3  ;;  %v571_v12 = vadd.f32 %v570_v10, %v522_v8  ;;  %v524_v14 = vpop.f32.mrf.mxu1 }
  0xb0   :  { %v525_v20 = vadd.f32 %v524_v14, %v475_v13 }
  0xb1   :  { %v620_v15 = vadd.f32 %v619_v11, %v571_v12 }
  0xb3   :  { %v1081_v17 = vpack.c.bf16 %v620_v15, %v618_v9  ;;  %v689_v18 = vadd.f32 %v620_v15, %v618_v9  ;;  %v711_v19 = vmul.f32 %v620_v15, %v620_v15 }
  0xb5   :  { %1082 = vst [vmem:[%s1474_s2] sm:$0xff] %v1081_v17   ;;  %v726_v21 = vadd.f32 %v711_v19, %v710_v16 }
  0xb6   :  { %v573_v22 = vpop.f32.mrf.mxu2  ;;  %v477_v25 = vpop.f32.mrf.mxu0 }
  0xb7   :  { %v622_v23 = vpop.f32.mrf.mxu3  ;;  %v574_v24 = vadd.f32 %v573_v22, %v525_v20  ;;  %v526_v26 = vpop.f32.mrf.mxu1 }
  0xb8   :  { %v527_v31 = vadd.f32 %v526_v26, %v477_v25 }
  0xb9   :  { %v623_v27 = vadd.f32 %v622_v23, %v574_v24 }
  0xbb   :  { %v690_v28 = vadd.f32 %v689_v18, %v623_v27  ;;  %v712_v29 = vmul.f32 %v623_v27, %v623_v27 }
  0xbd   :  { %v727_v30 = vadd.f32 %v726_v21, %v712_v29 }
  0xbe   :  { %v575_v32 = vpop.f32.mrf.mxu2  ;;  %v480_v35 = vpop.f32.mrf.mxu0 }
  0xbf   :  { %v624_v33 = vpop.f32.mrf.mxu3  ;;  %v576_v34 = vadd.f32 %v575_v32, %v527_v31  ;;  %v529_v36 = vpop.f32.mrf.mxu1 }
  0xc0   :  { %v530_v46 = vadd.f32 %v529_v36, %v480_v35 }
  0xc1   :  { %v625_v37 = vadd.f32 %v624_v33, %v576_v34 }
  0xc3   :  { %v1086_v38 = vpack.c.bf16 %v625_v37, %v623_v27  ;;  %v1436_v39 = vadd.f32 %v690_v28, %v625_v37  ;;  %v713_v40 = vmul.f32 %v625_v37, %v625_v37 }
  0xc5   :  { %1118 = vst [vmem:[%s1474_s2 + $0x8] sm:$0xff] %v1086_v38   ;;  %v1441_v41 = vadd.f32 %v727_v30, %v713_v40 }
  0xc6   :  { %v578_v42 = vpop.f32.mrf.mxu2  ;;  %v482_v44 = vpop.f32.mrf.mxu0 }
  0xc7   :  { %v627_v43 = vpop.f32.mrf.mxu3  ;;  %v531_v45 = vpop.f32.mrf.mxu1  ;;  %v579_v47 = vadd.f32 %v578_v42, %v530_v46 }
  0xc8   :  { %v532_v48 = vadd.f32 %v531_v45, %v482_v44 }
  0xc9   :  { %v628_v54 = vadd.f32 %v627_v43, %v579_v47 }
  0xcb   :  { %v714_v45 = vmul.f32 %v628_v54, %v628_v54  ;;  %v692_v47 = vadd.f32 %v1436_v39, %v628_v54 }
  0xce   :  { %v580_v49 = vpop.f32.mrf.mxu2  ;;  %v485_v52 = vpop.f32.mrf.mxu0 }
  0xcf   :  { %v629_v50 = vpop.f32.mrf.mxu3  ;;  %v581_v51 = vadd.f32 %v580_v49, %v532_v48  ;;  %v534_v53 = vpop.f32.mrf.mxu1 }
  0xd0   :  { %v535_v61 = vadd.f32 %v534_v53, %v485_v52 }
  0xd1   :  { %v1443_v55 = vadd.f32 %v629_v50, %v581_v51  ;;  %v729_v50 = vadd.f32 %v1441_v41, %v714_v45 }
  0xd3   :  { %v1091_v56 = vpack.c.bf16 %v1443_v55, %v628_v54  ;;  %v715_v46 = vmul.f32 %v1443_v55, %v1443_v55 }
  0xd5   :  { %1119 = vst [vmem:[%s1474_s2 + $0x10] sm:$0xff] %v1091_v56   ;;  %v693_v56 = vadd.f32 %v692_v47, %v1443_v55 }
  0xd6   :  { %v583_v57 = vpop.f32.mrf.mxu2  ;;  %v487_v59 = vpop.f32.mrf.mxu0 }
  0xd7   :  { %v632_v58 = vpop.f32.mrf.mxu3  ;;  %v536_v60 = vpop.f32.mrf.mxu1  ;;  %v584_v62 = vadd.f32 %v583_v57, %v535_v61 }
  0xd8   :  { %v537_v63 = vadd.f32 %v536_v60, %v487_v59 }
  0xd9   :  { %v633_v5 = vadd.f32 %v632_v58, %v584_v62  ;;  %v730_v58 = vadd.f32 %v729_v50, %v715_v46 }
  0xdb   :  { %v716_v51 = vmul.f32 %v633_v5, %v633_v5  ;;  %v694_v61 = vadd.f32 %v693_v56, %v633_v5 }
  0xde   :  { %v585_v0 = vpop.f32.mrf.mxu2  ;;  %v490_v3 = vpop.f32.mrf.mxu0 }
  0xdf   :  { %v634_v1 = vpop.f32.mrf.mxu3  ;;  %v586_v2 = vadd.f32 %v585_v0, %v537_v63  ;;  %v539_v4 = vpop.f32.mrf.mxu1 }
  0xe0   :  { %v540_v12 = vadd.f32 %v539_v4, %v490_v3 }
  0xe1   :  { %v635_v6 = vadd.f32 %v634_v1, %v586_v2  ;;  %v731_v1 = vadd.f32 %v730_v58, %v716_v51 }
  0xe3   :  { %v1096_v7 = vpack.c.bf16 %v635_v6, %v633_v5  ;;  %v717_v62 = vmul.f32 %v635_v6, %v635_v6  ;;  %v695_v2 = vadd.f32 %v694_v61, %v635_v6 }
  0xe5   :  { %1120 = vst [vmem:[%s1474_s2 + $0x18] sm:$0xff] %v1096_v7   ;;  %v732_v4 = vadd.f32 %v731_v1, %v717_v62 }
  0xe6   :  { %v588_v8 = vpop.f32.mrf.mxu2  ;;  %v492_v10 = vpop.f32.mrf.mxu0 }
  0xe7   :  { %v637_v9 = vpop.f32.mrf.mxu3  ;;  %v541_v11 = vpop.f32.mrf.mxu1  ;;  %v589_v13 = vadd.f32 %v588_v8, %v540_v12 }
  0xe8   :  { %v542_v14 = vadd.f32 %v541_v11, %v492_v10 }
  0xe9   :  { %v638_v20 = vadd.f32 %v637_v9, %v589_v13 }
  0xeb   :  { %v718_v39 = vmul.f32 %v638_v20, %v638_v20  ;;  %v696_v41 = vadd.f32 %v695_v2, %v638_v20 }
  0xed   :  { %v733_v9 = vadd.f32 %v732_v4, %v718_v39 }
  0xee   :  { %v590_v15 = vpop.f32.mrf.mxu2  ;;  %v495_v18 = vpop.f32.mrf.mxu0 }
  0xef   :  { %v639_v16 = vpop.f32.mrf.mxu3  ;;  %v591_v17 = vadd.f32 %v590_v15, %v542_v14  ;;  %v544_v19 = vpop.f32.mrf.mxu1 }
  0xf0   :  { %v545_v27 = vadd.f32 %v544_v19, %v495_v18 }
  0xf1   :  { %v640_v21 = vadd.f32 %v639_v16, %v591_v17 }
  0xf3   :  { %v1101_v22 = vpack.c.bf16 %v640_v21, %v638_v20  ;;  %v719_v7 = vmul.f32 %v640_v21, %v640_v21  ;;  %v697_v10 = vadd.f32 %v696_v41, %v640_v21 }
  0xf5   :  { %1121 = vst [vmem:[%s1474_s2 + $0x20] sm:$0xff] %v1101_v22   ;;  %v734_v12 = vadd.f32 %v733_v9, %v719_v7 }
  0xf6   :  { %v593_v23 = vpop.f32.mrf.mxu2  ;;  %v497_v25 = vpop.f32.mrf.mxu0 }
  0xf7   :  { %v642_v24 = vpop.f32.mrf.mxu3  ;;  %v546_v26 = vpop.f32.mrf.mxu1  ;;  %v594_v28 = vadd.f32 %v593_v23, %v545_v27 }
  0xf8   :  { %v547_v29 = vadd.f32 %v546_v26, %v497_v25 }
  0xf9   :  { %v643_v35 = vadd.f32 %v642_v24, %v594_v28 }
  0xfb   :  { %v720_v5 = vmul.f32 %v643_v35, %v643_v35  ;;  %v698_v13 = vadd.f32 %v697_v10, %v643_v35 }
  0xfd   :  { %v735_v16 = vadd.f32 %v734_v12, %v720_v5 }
  0xfe   :  { %v595_v30 = vpop.f32.mrf.mxu2  ;;  %v500_v33 = vpop.f32.mrf.mxu0 }
  0xff   :  { %v644_v31 = vpop.f32.mrf.mxu3  ;;  %v596_v32 = vadd.f32 %v595_v30, %v547_v29  ;;  %v549_v34 = vpop.f32.mrf.mxu1 }
 0x100   :  { %v550_v44 = vadd.f32 %v549_v34, %v500_v33 }
 0x101   :  { %v645_v36 = vadd.f32 %v644_v31, %v596_v32 }
 0x103   :  { %v1106_v37 = vpack.c.bf16 %v645_v36, %v643_v35  ;;  %v721_v14 = vmul.f32 %v645_v36, %v645_v36  ;;  %v699_v17 = vadd.f32 %v698_v13, %v645_v36 }
 0x105   :  { %1122 = vst [vmem:[%s1474_s2 + $0x28] sm:$0xff] %v1106_v37   ;;  %v736_v20 = vadd.f32 %v735_v16, %v721_v14 }
 0x106   :  { %v598_v38 = vpop.f32.mrf.mxu2  ;;  %v502_v42 = vpop.f32.mrf.mxu0 }
 0x107   :  { %v647_v40 = vpop.f32.mrf.mxu3  ;;  %v551_v43 = vpop.f32.mrf.mxu1  ;;  %v599_v48 = vadd.f32 %v598_v38, %v550_v44 }
 0x108   :  { %v552_v49 = vadd.f32 %v551_v43, %v502_v42 }
 0x109   :  { %v648_v63 = vadd.f32 %v647_v40, %v599_v48 }
 0x10b   :  { %v722_v18 = vmul.f32 %v648_v63, %v648_v63  ;;  %v700_v22 = vadd.f32 %v699_v17, %v648_v63 }
 0x10d   :  { %v737_v26 = vadd.f32 %v736_v20, %v722_v18 }
 0x10e   :  { %v600_v52 = vpop.f32.mrf.mxu2  ;;  %v505_v59 = vpop.f32.mrf.mxu0 }
 0x10f   :  { %v649_v53 = vpop.f32.mrf.mxu3  ;;  %v601_v57 = vadd.f32 %v600_v52, %v552_v49  ;;  %v554_v60 = vpop.f32.mrf.mxu1 }
 0x110   :  { %v555_v3 = vadd.f32 %v554_v60, %v505_v59 }
 0x111   :  { %v650_v0 = vadd.f32 %v649_v53, %v601_v57 }
 0x113   :  { %v1111_v54 = vpack.c.bf16 %v650_v0, %v648_v63  ;;  %v723_v23 = vmul.f32 %v650_v0, %v650_v0  ;;  %v701_v27 = vadd.f32 %v700_v22, %v650_v0 }
 0x115   :  { %1123 = vst [vmem:[%s1474_s2 + $0x30] sm:$0xff] %v1111_v54   ;;  %v738_v30 = vadd.f32 %v737_v26, %v723_v23 }
 0x116   :  { %v603_v55 = vpop.f32.mrf.mxu2  ;;  %v507_v6 = vpop.f32.mrf.mxu0 }
 0x117   :  { %v652_v8 = vpop.f32.mrf.mxu3  ;;  %v604_v11 = vadd.f32 %v603_v55, %v555_v3  ;;  %v556_v15 = vpop.f32.mrf.mxu1 }
 0x118   :  { %v557_v24 = vadd.f32 %v556_v15, %v507_v6 }
 0x119   :  { %v653_v19 = vadd.f32 %v652_v8, %v604_v11 }
 0x11b   :  { %v724_v28 = vmul.f32 %v653_v19, %v653_v19  ;;  %v702_v31 = vadd.f32 %v701_v27, %v653_v19 }
 0x11d   :  { %v739_v33 = vadd.f32 %v738_v30, %v724_v28 }
 0x11e   :  { %v605_v25 = vpop.f32.mrf.mxu2 }
 0x11f   :  { %v606_v21 = vadd.f32 %v605_v25, %v557_v24  ;;  %v654_v29 = vpop.f32.mrf.mxu3 }
 0x121   :  { %v655_v32 = vadd.f32 %v654_v29, %v606_v21 }
 0x123   :  { %v1116_v34 = vpack.c.bf16 %v655_v32, %v653_v19  ;;  %v703_v35 = vadd.f32 %v702_v31, %v655_v32  ;;  %v725_v37 = vmul.f32 %v655_v32, %v655_v32 }
 0x125   :  { %1124 = vst [vmem:[%s1474_s2 + $0x38] sm:$0xff] %v1116_v34   ;;  %v704_v36 = vrot.slane %v703_v35, 4  ;;  %v740_v38 = vadd.f32 %v739_v33, %v725_v37 }
 0x127   :  { %v705_v40 = vadd.f32 %v704_v36, %v703_v35  ;;  %v741_v42 = vrot.slane %v740_v38, 4 }
 0x129   :  { %v706_v43 = vrot.slane %v705_v40, 2  ;;  %v742_v44 = vadd.f32 %v741_v42, %v740_v38 }
 0x12b   :  { %v707_v45 = vadd.f32 %v706_v43, %v705_v40  ;;  %v743_v46 = vrot.slane %v742_v44, 2 }
 0x12d   :  { %v708_v47 = vrot.slane %v707_v45, 1  ;;  %v744_v48 = vadd.f32 %v743_v46, %v742_v44 }
 0x12f   :  { %v745_v49 = vrot.slane %v744_v48, 1  ;;  %v709_v50 = vadd.f32 %v708_v47, %v707_v45 }
 0x131   :  { %v746_v51 = vadd.f32 %v745_v49, %v744_v48 }
 0x133   :  { %v748_v52 = vsel %vm747_vm0, %v709_v50, %v746_v51 }
 0x134   :  { %749 = vst [vmem:[%s1475_s3] sm:$0x3] %v748_v52 }

// kernel: _lambda_.9
= control target key start
LH: loop header
LB: loop body
LE: loop exit
PB: predicated region body
PF: predicated region fallthrough
CT: control target
= control target key end

     0   :  { %vm71_vm0 = vcmask 1041409   ;;  %vm74_vm1 = vcmask 1041408   ;;  %vm97_vm5 = vcmask 1024   ;;  %s165_s0 = inlined_call_operand.vmem [shape: bf16[2,16,128], index: 0, kind: input, shape index: {}]   ;;  %s166_s1 = inlined_call_operand.vmem [shape: f32[1,128], index: 1, kind: input, shape index: {}]   ;;  %s167_s2 = inlined_call_operand.vmem [shape: f32[1,128], index: 2, kind: input, shape index: {}]   ;;  %s168_s3 = inlined_call_operand.vmem [shape: f32[16,128], index: 3, kind: input, shape index: {}]   ;;  %s169_s4 = inlined_call_operand.vmem [shape: f32[2,1], index: 4, kind: output, shape index: {}]  }
   0x1   :  { %v105_v0 = vld [vmem:[%s165_s0] sm:$0xff]   ;;  %v112_v1 = vld [vmem:[%s165_s0 + $0x8] sm:$0xff]  }
   0x2   :  { %v106_v2 = vunpack.c.l.bf16 %v105_v0  ;;  %v107_v3 = vunpack.c.h.bf16 %v105_v0  ;;  %v110_v4 = vunpack.c.l.bf16 %v112_v1  ;;  %v111_v5 = vunpack.c.h.bf16 %v112_v1  ;;  %v113_v6 = vld [vmem:[%s166_s1] ss:$0 sm:$0xff]  ;;  %v50_v21 = vld [vmem:[%s168_s3 + $0x8] sm:$0xff] }
   0x3   :  { %v114_v7 = vld [vmem:[%s167_s2] ss:$0 sm:$0xff] }
   0x4   :  { %v29_v8 = vmul.f32 %v113_v6, %v106_v2  ;;  %v30_v9 = vmul.f32 %v113_v6, %v107_v3  ;;  %v31_v10 = vmul.f32 %v113_v6, %v110_v4  ;;  %v32_v11 = vmul.f32 %v113_v6, %v111_v5  ;;  %v49_v20 = vld [vmem:[%s168_s3] sm:$0xff] }
   0x6   :  { %v37_v12 = vadd.f32 %v114_v7, %v29_v8  ;;  %v38_v13 = vadd.f32 %v114_v7, %v30_v9  ;;  %v39_v14 = vadd.f32 %v114_v7, %v31_v10  ;;  %v40_v15 = vadd.f32 %v114_v7, %v32_v11 }
   0x8   :  { %v41_v16 = vmul.f32 0.2, %v37_v12  ;;  %v42_v17 = vmul.f32 0.2, %v38_v13  ;;  %v43_v18 = vmul.f32 0.2, %v39_v14 }
   0x9   :  { %v44_v19 = vmul.f32 0.2, %v40_v15 }
   0xa   :  { %v45_v22 = vmax.f32 %v37_v12, %v41_v16  ;;  %v46_v23 = vmax.f32 %v38_v13, %v42_v17  ;;  %v47_v24 = vmax.f32 %v39_v14, %v43_v18 }
   0xb   :  { %v48_v25 = vmax.f32 %v40_v15, %v44_v19 }
   0xc   :  { %v51_v26 = vmul.f32 %v49_v20, %v45_v22  ;;  %v52_v27 = vmul.f32 %v50_v21, %v46_v23  ;;  %v53_v28 = vmul.f32 %v49_v20, %v47_v24 }
   0xd   :  { %v54_v29 = vmul.f32 %v50_v21, %v48_v25 }
   0xe   :  { %v55_v30 = vadd.f32 %v52_v27, %v51_v26 }
   0xf   :  { %v62_v31 = vadd.f32 %v54_v29, %v53_v28 }
  0x10   :  { %v56_v32 = vrot.slane %v55_v30, 4 }
  0x11   :  { %v63_v33 = vrot.slane %v62_v31, 4 }
  0x12   :  { %v57_v34 = vadd.f32 %v56_v32, %v55_v30 }
  0x13   :  { %v64_v35 = vadd.f32 %v63_v33, %v62_v31 }
  0x14   :  { %v58_v36 = vrot.slane %v57_v34, 2 }
  0x15   :  { %v65_v37 = vrot.slane %v64_v35, 2 }
  0x16   :  { %v59_v38 = vadd.f32 %v58_v36, %v57_v34 }
  0x17   :  { %v66_v39 = vadd.f32 %v65_v37, %v64_v35 }
  0x18   :  { %v60_v40 = vrot.slane %v59_v38, 1 }
  0x19   :  { %v67_v41 = vrot.slane %v66_v39, 1 }
  0x1a   :  { %v61_v42 = vadd.f32 %v60_v40, %v59_v38 }
  0x1b   :  { %v68_v43 = vadd.f32 %v67_v41, %v66_v39 }
  0x1d   :  { %v72_v44 = vsel %vm71_vm0, %v68_v43, %v61_v42 }
  0x1e   :  { %v75_v45 = vsel %vm74_vm1, %v72_v44, 0.0 }
  0x1f   :  { %76 = vadd.xlane.f32.xlu0 %v75_v45 }
  0x92   :  { %v77_v46 = vpop.xlane.xlu0 %76 }
  0x93   :  { %v103_v47 = vmul.f32 -1.442695, %v77_v46 }
  0x95   :  { %115 = vpow2.f32 %v103_v47 }
  0x9b   :  { %v116_v48 = vpop.eup %115 }
  0x9c   :  { %v81_v49 = vadd.f32 1.0, %v116_v48 }
  0x9e   :  { %117 = vrcp.f32 %v81_v49  ;;  %v93_v53 = vand.u32 2147483648, %v81_v49  ;;  %v91_v55 = vand.u32 2147483647, %v81_v49  ;;  %vm87_vm3 = vweird.f32 %v81_v49 }
  0xa0   :  { %v94_v57 = vor.u32 1.1754944e-38, %v93_v53  ;;  %vm92_vm6 = vcmp.eq.f32.partialorder %v91_v55, 8.507059e+37 }
  0xa4   :  { %v118_v50 = vpop.eup %117 }
  0xa5   :  { %v83_v51 = vmul.f32 %v118_v50, %v81_v49  ;;  %vm88_vm2 = vweird.f32 %v118_v50 }
  0xa6   :  { %vm89_vm4 = vmor %vm87_vm3, %vm88_vm2 }
  0xa7   :  { %v84_v52 = vsub.f32 1.0, %v83_v51 }
  0xa9   :  { %v85_v54 = vmul.f32 %v118_v50, %v84_v52 }
  0xab   :  { %v86_v56 = vadd.f32 %v118_v50, %v85_v54 }
  0xad   :  { %v90_v58 = vsel %vm89_vm4, %v118_v50, %v86_v56 }
  0xae   :  { %v95_v59 = vsel %vm92_vm6, %v94_v57, %v90_v58 }
  0xaf   :  { %98 = vst.msk [vmem:[%s169_s4] sm:$0x3] %vm97_vm5, %v95_v59 }

// kernel: _lambda_.8
= control target key start
LH: loop header
LB: loop body
LE: loop exit
PB: predicated region body
PF: predicated region fallthrough
CT: control target
= control target key end

     0   :  { %vm803_vm0 = vcmask 1040384   ;;  %s1542_s1 = inlined_call_operand.vmem [shape: bf16[1024,128], index: 1, kind: input, shape index: {}]   ;;  %s1543_s0 = inlined_call_operand.vmem [shape: bf16[32,1024], index: 0, kind: input, shape index: {}]   ;;  %s1544_s2 = inlined_call_operand.vmem [shape: bf16[32,128], index: 2, kind: output, shape index: {0}]   ;;  %s1545_s3 = inlined_call_operand.vmem [shape: f32[1,2,128], index: 3, kind: output, shape index: {1}]  }
   0x1   :  { %v1157_v0 = vld [vmem:[%s1542_s1 + $0x38] sm:$0xff]  ;;  %v1156_v4 = vld [vmem:[%s1542_s1 + $0x30] sm:$0xff]  ;;  %v1155_v8 = vld [vmem:[%s1542_s1 + $0x28] sm:$0xff] }
   0x2   :  { %v1165_v1 = vld [vmem:[%s1542_s1 + $0x78] sm:$0xff]  ;;  %621 = vmatpush.bf16.msra.mxu0 %v1157_v0  ;;  %v1164_v5 = vld [vmem:[%s1542_s1 + $0x70] sm:$0xff]  ;;  %v1163_v9 = vld [vmem:[%s1542_s1 + $0x68] sm:$0xff] }
   0x3   :  { %v1173_v2 = vld [vmem:[%s1542_s1 + $0xb8] sm:$0xff]  ;;  %640 = vmatpush.bf16.msra.mxu1 %v1165_v1  ;;  %v1172_v6 = vld [vmem:[%s1542_s1 + $0xb0] sm:$0xff]  ;;  %v1171_v10 = vld [vmem:[%s1542_s1 + $0xa8] sm:$0xff] }
   0x4   :  { %v1181_v3 = vld [vmem:[%s1542_s1 + $0xf8] sm:$0xff]  ;;  %659 = vmatpush.bf16.msra.mxu2 %v1173_v2  ;;  %v1180_v7 = vld [vmem:[%s1542_s1 + $0xf0] sm:$0xff]  ;;  %v1179_v11 = vld [vmem:[%s1542_s1 + $0xe8] sm:$0xff] }
   0x5   :  { %678 = vmatpush.bf16.msra.mxu3 %v1181_v3  ;;  %v1154_v12 = vld [vmem:[%s1542_s1 + $0x20] sm:$0xff]  ;;  %v1153_v16 = vld [vmem:[%s1542_s1 + $0x18] sm:$0xff]  ;;  %v1152_v20 = vld [vmem:[%s1542_s1 + $0x10] sm:$0xff] }
   0x6   :  { %622 = vmatpush.bf16.msra.mxu0 %v1156_v4  ;;  %v1162_v13 = vld [vmem:[%s1542_s1 + $0x60] sm:$0xff]  ;;  %v1161_v17 = vld [vmem:[%s1542_s1 + $0x58] sm:$0xff]  ;;  %v1160_v21 = vld [vmem:[%s1542_s1 + $0x50] sm:$0xff] }
   0x7   :  { %641 = vmatpush.bf16.msra.mxu1 %v1164_v5  ;;  %v1170_v14 = vld [vmem:[%s1542_s1 + $0xa0] sm:$0xff]  ;;  %v1169_v18 = vld [vmem:[%s1542_s1 + $0x98] sm:$0xff]  ;;  %v1168_v22 = vld [vmem:[%s1542_s1 + $0x90] sm:$0xff] }
   0x8   :  { %660 = vmatpush.bf16.msra.mxu2 %v1172_v6  ;;  %v1178_v15 = vld [vmem:[%s1542_s1 + $0xe0] sm:$0xff]  ;;  %v1177_v19 = vld [vmem:[%s1542_s1 + $0xd8] sm:$0xff]  ;;  %v1176_v23 = vld [vmem:[%s1542_s1 + $0xd0] sm:$0xff] }
   0x9   :  { %679 = vmatpush.bf16.msra.mxu3 %v1180_v7  ;;  %v1151_v24 = vld [vmem:[%s1542_s1 + $0x8] sm:$0xff]  ;;  %v1150_v28 = vld [vmem:[%s1542_s1] sm:$0xff]  ;;  %v1205_v40 = vld [vmem:[%s1542_s1 + $0x1b8] sm:$0xff] }
   0xa   :  { %623 = vmatpush.bf16.msra.mxu0 %v1155_v8  ;;  %v1159_v25 = vld [vmem:[%s1542_s1 + $0x48] sm:$0xff]  ;;  %v1158_v29 = vld [vmem:[%s1542_s1 + $0x40] sm:$0xff]  ;;  %v1189_v41 = vld [vmem:[%s1542_s1 + $0x138] sm:$0xff] }
   0xb   :  { %642 = vmatpush.bf16.msra.mxu1 %v1163_v9  ;;  %v1167_v26 = vld [vmem:[%s1542_s1 + $0x88] sm:$0xff]  ;;  %v1166_v30 = vld [vmem:[%s1542_s1 + $0x80] sm:$0xff]  ;;  %v1197_v46 = vld [vmem:[%s1542_s1 + $0x178] sm:$0xff] }
   0xc   :  { %661 = vmatpush.bf16.msra.mxu2 %v1171_v10  ;;  %v1175_v27 = vld [vmem:[%s1542_s1 + $0xc8] sm:$0xff]  ;;  %v1174_v31 = vld [vmem:[%s1542_s1 + $0xc0] sm:$0xff]  ;;  %v1213_v47 = vld [vmem:[%s1542_s1 + $0x1f8] sm:$0xff] }
   0xd   :  { %680 = vmatpush.bf16.msra.mxu3 %v1179_v11  ;;  %v816_v32 = vld [vmem:[%s1543_s0] sm:$0xf]  ;;  %v1134_v34 = vld [vmem:[%s1543_s0 + $0x4] sm:$0xf]  ;;  %v824_v36 = vld [vmem:[%s1543_s0 + $0x8] sm:$0xf] }
   0xe   :  { %624 = vmatpush.bf16.msra.mxu0 %v1154_v12  ;;  %v1138_v33 = vld [vmem:[%s1543_s0 + $0x1c] sm:$0xf0]  ;;  %v818_v35 = vld [vmem:[%s1543_s0 + $0x20] sm:$0xf0]  ;;  %v1139_v37 = vld [vmem:[%s1543_s0 + $0x24] sm:$0xf0] }
   0xf   :  { %643 = vmatpush.bf16.msra.mxu1 %v1162_v13  ;;  %v1135_v38 = vld [vmem:[%s1543_s0 + $0xc] sm:$0xf]  ;;  %v817_v42 = vor.u32 %v1138_v33, %v816_v32  ;;  %v821_v43 = vor.u32 %v1134_v34, %v818_v35  ;;  %v825_v44 = vor.u32 %v1139_v37, %v824_v36  ;;  %v1204_v48 = vld [vmem:[%s1542_s1 + $0x1b0] sm:$0xff]  ;;  %v1202_v56 = vld [vmem:[%s1542_s1 + $0x1a0] sm:$0xff] }
  0x10   :  { %662 = vmatpush.bf16.msra.mxu2 %v1170_v14  ;;  %v826_v39 = vld [vmem:[%s1543_s0 + $0x28] sm:$0xf0]  ;;  %v1188_v49 = vld [vmem:[%s1542_s1 + $0x130] sm:$0xff]  ;;  %v1186_v57 = vld [vmem:[%s1542_s1 + $0x120] sm:$0xff] }
  0x11   :  { %681 = vmatpush.bf16.msra.mxu3 %v1178_v15  ;;  %v829_v45 = vor.u32 %v1135_v38, %v826_v39  ;;  %v1196_v50 = vld [vmem:[%s1542_s1 + $0x170] sm:$0xff]  ;;  %v1203_v52 = vld [vmem:[%s1542_s1 + $0x1a8] sm:$0xff]  ;;  %v1194_v58 = vld [vmem:[%s1542_s1 + $0x160] sm:$0xff] }
  0x12   :  { %625 = vmatpush.bf16.msra.mxu0 %v1153_v16  ;;  %v1212_v51 = vld [vmem:[%s1542_s1 + $0x1f0] sm:$0xff]  ;;  %v1187_v53 = vld [vmem:[%s1542_s1 + $0x128] sm:$0xff]  ;;  %v1210_v59 = vld [vmem:[%s1542_s1 + $0x1e0] sm:$0xff] }
  0x13   :  { %644 = vmatpush.bf16.msra.mxu1 %v1161_v17  ;;  %v1195_v54 = vld [vmem:[%s1542_s1 + $0x168] sm:$0xff]  ;;  %v848_v60 = vld [vmem:[%s1543_s0 + $0x40] sm:$0xf]  ;;  %v1142_v62 = vld [vmem:[%s1543_s0 + $0x44] sm:$0xf] }
  0x14   :  { %663 = vmatpush.bf16.msra.mxu2 %v1169_v18  ;;  %v1211_v55 = vld [vmem:[%s1542_s1 + $0x1e8] sm:$0xff]  ;;  %v1146_v61 = vld [vmem:[%s1543_s0 + $0x5c] sm:$0xf0]  ;;  %v850_v63 = vld [vmem:[%s1543_s0 + $0x60] sm:$0xf0] }
  0x15   :  { %682 = vmatpush.bf16.msra.mxu3 %v1177_v19  ;;  %v856_v0 = vld [vmem:[%s1543_s0 + $0x48] sm:$0xf]  ;;  %v1143_v2 = vld [vmem:[%s1543_s0 + $0x4c] sm:$0xf]  ;;  %v1201_v4 = vld [vmem:[%s1542_s1 + $0x198] sm:$0xff]  ;;  %v849_v6 = vor.u32 %v1146_v61, %v848_v60  ;;  %v853_v7 = vor.u32 %v1142_v62, %v850_v63 }
  0x16   :  { %626 = vmatpush.bf16.msra.mxu0 %v1152_v20  ;;  %v1147_v1 = vld [vmem:[%s1543_s0 + $0x64] sm:$0xf0]  ;;  %v858_v3 = vld [vmem:[%s1543_s0 + $0x68] sm:$0xf0]  ;;  %v1185_v5 = vld [vmem:[%s1542_s1 + $0x118] sm:$0xff] }
  0x17   :  { %645 = vmatpush.bf16.msra.mxu1 %v1160_v21  ;;  %v857_v8 = vor.u32 %v1147_v1, %v856_v0  ;;  %v861_v9 = vor.u32 %v1143_v2, %v858_v3  ;;  %v1193_v10 = vld [vmem:[%s1542_s1 + $0x158] sm:$0xff]  ;;  %v1200_v12 = vld [vmem:[%s1542_s1 + $0x190] sm:$0xff]  ;;  %v1199_v16 = vld [vmem:[%s1542_s1 + $0x188] sm:$0xff] }
  0x18   :  { %664 = vmatpush.bf16.msra.mxu2 %v1168_v22  ;;  %v1209_v11 = vld [vmem:[%s1542_s1 + $0x1d8] sm:$0xff]  ;;  %v1184_v13 = vld [vmem:[%s1542_s1 + $0x110] sm:$0xff]  ;;  %v1183_v17 = vld [vmem:[%s1542_s1 + $0x108] sm:$0xff] }
  0x19   :  { %683 = vmatpush.bf16.msra.mxu3 %v1176_v23  ;;  %v1192_v14 = vld [vmem:[%s1542_s1 + $0x150] sm:$0xff]  ;;  %v1191_v18 = vld [vmem:[%s1542_s1 + $0x148] sm:$0xff]  ;;  %v1198_v20 = vld [vmem:[%s1542_s1 + $0x180] sm:$0xff] }
  0x1a   :  { %627 = vmatpush.bf16.msra.mxu0 %v1151_v24  ;;  %v1208_v15 = vld [vmem:[%s1542_s1 + $0x1d0] sm:$0xff]  ;;  %v1207_v19 = vld [vmem:[%s1542_s1 + $0x1c8] sm:$0xff]  ;;  %v1182_v21 = vld [vmem:[%s1542_s1 + $0x100] sm:$0xff] }
  0x1b   :  { %646 = vmatpush.bf16.msra.mxu1 %v1159_v25  ;;  %v1190_v22 = vld [vmem:[%s1542_s1 + $0x140] sm:$0xff]  ;;  %v832_v24 = vld [vmem:[%s1543_s0 + $0x10] sm:$0xf]  ;;  %v1144_v38 = vld [vmem:[%s1543_s0 + $0x54] sm:$0xf] }
  0x1c   :  { %665 = vmatpush.bf16.msra.mxu2 %v1167_v26  ;;  %v1206_v23 = vld [vmem:[%s1542_s1 + $0x1c0] sm:$0xff]  ;;  %v1140_v25 = vld [vmem:[%s1543_s0 + $0x2c] sm:$0xf0]  ;;  %v1136_v26 = vld [vmem:[%s1543_s0 + $0x14] sm:$0xf] }
  0x1d   :  { %684 = vmatpush.bf16.msra.mxu3 %v1175_v27  ;;  %v834_v27 = vld [vmem:[%s1543_s0 + $0x30] sm:$0xf0]  ;;  %v833_v32 = vor.u32 %v1140_v25, %v832_v24  ;;  %v864_v36 = vld [vmem:[%s1543_s0 + $0x50] sm:$0xf] }
  0x1e   :  { %628 = vmatpush.bf16.msra.mxu0 %v1150_v28  ;;  %v840_v28 = vld [vmem:[%s1543_s0 + $0x18] sm:$0xf]  ;;  %v837_v33 = vor.u32 %v1136_v26, %v834_v27  ;;  %v1148_v37 = vld [vmem:[%s1543_s0 + $0x6c] sm:$0xf0]  ;;  %v866_v39 = vld [vmem:[%s1543_s0 + $0x70] sm:$0xf0] }
  0x1f   :  { %647 = vmatpush.bf16.msra.mxu1 %v1158_v29  ;;  %v1141_v29 = vld [vmem:[%s1543_s0 + $0x34] sm:$0xf0] }
  0x20   :  { %666 = vmatpush.bf16.msra.mxu2 %v1166_v30  ;;  %v1137_v30 = vld [vmem:[%s1543_s0 + $0x1c] sm:$0xf]  ;;  %v841_v34 = vor.u32 %v1141_v29, %v840_v28 }
  0x21   :  { %685 = vmatpush.bf16.msra.mxu3 %v1174_v31  ;;  %629 = vmatmul.bf16.vlgmr.msra.gmra.mxu0 %v817_v42  ;;  %v842_v31 = vld [vmem:[%s1543_s0 + $0x38] sm:$0xf0] }
  0x22   :  { %697 = vmatpush.bf16.msrb.mxu0 %v1189_v41  ;;  %648 = vmatmul.bf16.vlgmr.msra.gmra.mxu1 %v821_v43  ;;  %v845_v35 = vor.u32 %v1137_v30, %v842_v31  ;;  %v1149_v41 = vld [vmem:[%s1543_s0 + $0x74] sm:$0xf0]  ;;  %v1145_v42 = vld [vmem:[%s1543_s0 + $0x5c] sm:$0xf] }
  0x23   :  { %667 = vmatmul.bf16.vlgmr.msra.gmra.mxu2 %v825_v44  ;;  %716 = vmatpush.bf16.msrb.mxu1 %v1197_v46  ;;  %v874_v43 = vld [vmem:[%s1543_s0 + $0x78] sm:$0xf0]  ;;  %v865_v44 = vor.u32 %v1148_v37, %v864_v36 }
  0x24   :  { %735 = vmatpush.bf16.msrb.mxu2 %v1205_v40  ;;  %686 = vmatmul.bf16.vlgmr.msra.gmra.mxu3 %v829_v45  ;;  %v872_v40 = vld [vmem:[%s1543_s0 + $0x58] sm:$0xf]  ;;  %v869_v45 = vor.u32 %v1144_v38, %v866_v39 }
  0x25   :  { %754 = vmatpush.bf16.msrb.mxu3 %v1213_v47  ;;  %v873_v46 = vor.u32 %v1149_v41, %v872_v40  ;;  %v877_v47 = vor.u32 %v1145_v42, %v874_v43 }
  0x26   :  { %698 = vmatpush.bf16.msrb.mxu0 %v1188_v49 }
  0x27   :  { %717 = vmatpush.bf16.msrb.mxu1 %v1196_v50 }
  0x28   :  { %736 = vmatpush.bf16.msrb.mxu2 %v1204_v48 }
  0x29   :  { %755 = vmatpush.bf16.msrb.mxu3 %v1212_v51 }
  0x2a   :  { %699 = vmatpush.bf16.msrb.mxu0 %v1187_v53 }
  0x2b   :  { %718 = vmatpush.bf16.msrb.mxu1 %v1195_v54 }
  0x2c   :  { %737 = vmatpush.bf16.msrb.mxu2 %v1203_v52 }
  0x2d   :  { %756 = vmatpush.bf16.msrb.mxu3 %v1211_v55 }
  0x2e   :  { %700 = vmatpush.bf16.msrb.mxu0 %v1186_v57 }
  0x2f   :  { %719 = vmatpush.bf16.msrb.mxu1 %v1194_v58 }
  0x30   :  { %738 = vmatpush.bf16.msrb.mxu2 %v1202_v56 }
  0x31   :  { %757 = vmatpush.bf16.msrb.mxu3 %v1210_v59  ;;  %634 = vmatmul.bf16.gmra.mxu0 %v849_v6 }
  0x32   :  { %701 = vmatpush.bf16.msrb.mxu0 %v1185_v5  ;;  %653 = vmatmul.bf16.gmra.mxu1 %v853_v7 }
  0x33   :  { %672 = vmatmul.bf16.gmra.mxu2 %v857_v8  ;;  %720 = vmatpush.bf16.msrb.mxu1 %v1193_v10 }
  0x34   :  { %739 = vmatpush.bf16.msrb.mxu2 %v1201_v4  ;;  %691 = vmatmul.bf16.gmra.mxu3 %v861_v9 }
  0x35   :  { %758 = vmatpush.bf16.msrb.mxu3 %v1209_v11 }
  0x36   :  { %702 = vmatpush.bf16.msrb.mxu0 %v1184_v13 }
  0x37   :  { %721 = vmatpush.bf16.msrb.mxu1 %v1192_v14 }
  0x38   :  { %740 = vmatpush.bf16.msrb.mxu2 %v1200_v12 }
  0x39   :  { %759 = vmatpush.bf16.msrb.mxu3 %v1208_v15 }
  0x3a   :  { %703 = vmatpush.bf16.msrb.mxu0 %v1183_v17 }
  0x3b   :  { %722 = vmatpush.bf16.msrb.mxu1 %v1191_v18 }
  0x3c   :  { %741 = vmatpush.bf16.msrb.mxu2 %v1199_v16 }
  0x3d   :  { %760 = vmatpush.bf16.msrb.mxu3 %v1207_v19 }
  0x3e   :  { %704 = vmatpush.bf16.msrb.mxu0 %v1182_v21 }
  0x3f   :  { %723 = vmatpush.bf16.msrb.mxu1 %v1190_v22 }
  0x40   :  { %742 = vmatpush.bf16.msrb.mxu2 %v1198_v20 }
  0x41   :  { %761 = vmatpush.bf16.msrb.mxu3 %v1206_v23  ;;  %705 = vmatmul.bf16.vlgmr.msrb.gmra.mxu0 %v833_v32 }
  0x42   :  { %724 = vmatmul.bf16.vlgmr.msrb.gmra.mxu1 %v837_v33 }
  0x43   :  { %743 = vmatmul.bf16.vlgmr.msrb.gmra.mxu2 %v841_v34 }
  0x44   :  { %762 = vmatmul.bf16.vlgmr.msrb.gmra.mxu3 %v845_v35 }
  0x51   :  { %710 = vmatmul.bf16.gmra.mxu0 %v865_v44 }
  0x52   :  { %729 = vmatmul.bf16.gmra.mxu1 %v869_v45 }
  0x53   :  { %748 = vmatmul.bf16.gmra.mxu2 %v873_v46 }
  0x54   :  { %767 = vmatmul.bf16.gmra.mxu3 %v877_v47 }
  0x9e   :  { %v630_v48 = vpop.f32.mrf.mxu0 }
  0x9f   :  { %v649_v49 = vpop.f32.mrf.mxu1 }
  0xa0   :  { %v650_v0 = vadd.f32 %v649_v49, %v630_v48 }
  0xa6   :  { %v668_v50 = vpop.f32.mrf.mxu2  ;;  %v632_v52 = vpop.f32.mrf.mxu0 }
  0xa7   :  { %v687_v51 = vpop.f32.mrf.mxu3  ;;  %v651_v53 = vpop.f32.mrf.mxu1  ;;  %v669_v3 = vadd.f32 %v668_v50, %v650_v0 }
  0xa8   :  { %v652_v4 = vadd.f32 %v651_v53, %v632_v52 }
  0xa9   :  { %v688_v6 = vadd.f32 %v687_v51, %v669_v3 }
  0xae   :  { %v670_v54 = vpop.f32.mrf.mxu2  ;;  %v635_v56 = vpop.f32.mrf.mxu0 }
  0xaf   :  { %v689_v55 = vpop.f32.mrf.mxu3  ;;  %v654_v57 = vpop.f32.mrf.mxu1  ;;  %v671_v5 = vadd.f32 %v670_v54, %v652_v4 }
  0xb0   :  { %v655_v13 = vadd.f32 %v654_v57, %v635_v56 }
  0xb1   :  { %v690_v8 = vadd.f32 %v689_v55, %v671_v5 }
  0xb6   :  { %v673_v58 = vpop.f32.mrf.mxu2  ;;  %v637_v60 = vpop.f32.mrf.mxu0 }
  0xb7   :  { %v692_v59 = vpop.f32.mrf.mxu3  ;;  %v656_v61 = vpop.f32.mrf.mxu1  ;;  %v674_v15 = vadd.f32 %v673_v58, %v655_v13 }
  0xb8   :  { %v657_v24 = vadd.f32 %v656_v61, %v637_v60 }
  0xb9   :  { %v693_v20 = vadd.f32 %v692_v59, %v674_v15 }
  0xbe   :  { %v675_v62 = vpop.f32.mrf.mxu2  ;;  %v706_v1 = vpop.f32.mrf.mxu0 }
  0xbf   :  { %v694_v63 = vpop.f32.mrf.mxu3  ;;  %v725_v2 = vpop.f32.mrf.mxu1  ;;  %v707_v9 = vadd.f32 %v706_v1, %v688_v6  ;;  %v676_v29 = vadd.f32 %v675_v62, %v657_v24 }
  0xc1   :  { %v726_v16 = vadd.f32 %v725_v2, %v707_v9  ;;  %v695_v33 = vadd.f32 %v694_v63, %v676_v29 }
  0xc6   :  { %v744_v7 = vpop.f32.mrf.mxu2  ;;  %v708_v11 = vpop.f32.mrf.mxu0 }
  0xc7   :  { %v763_v10 = vpop.f32.mrf.mxu3  ;;  %v727_v12 = vpop.f32.mrf.mxu1  ;;  %v709_v14 = vadd.f32 %v708_v11, %v690_v8  ;;  %v745_v17 = vadd.f32 %v744_v7, %v726_v16 }
  0xc9   :  { %v728_v18 = vadd.f32 %v727_v12, %v709_v14  ;;  %v764_v25 = vadd.f32 %v763_v10, %v745_v17 }
  0xcb   :  { %v790_v43 = vmul.f32 %v764_v25, %v764_v25 }
  0xce   :  { %v746_v19 = vpop.f32.mrf.mxu2  ;;  %v711_v23 = vpop.f32.mrf.mxu0 }
  0xcf   :  { %v747_v21 = vadd.f32 %v746_v19, %v728_v18  ;;  %v765_v22 = vpop.f32.mrf.mxu3  ;;  %v712_v27 = vadd.f32 %v711_v23, %v693_v20  ;;  %v730_v28 = vpop.f32.mrf.mxu1 }
  0xd1   :  { %v766_v26 = vadd.f32 %v765_v22, %v747_v21  ;;  %v731_v31 = vadd.f32 %v730_v28, %v712_v27 }
  0xd3   :  { %v1217_v30 = vpack.c.bf16 %v766_v26, %v764_v25  ;;  %v791_v40 = vmul.f32 %v766_v26, %v766_v26  ;;  %v781_v44 = vadd.f32 %v766_v26, %v764_v25 }
  0xd5   :  { %1218 = vst [vmem:[%s1544_s2] sm:$0xff] %v1217_v30   ;;  %v794_v48 = vadd.f32 %v791_v40, %v790_v43 }
  0xd6   :  { %v749_v32 = vpop.f32.mrf.mxu2  ;;  %v713_v36 = vpop.f32.mrf.mxu0 }
  0xd7   :  { %v750_v34 = vadd.f32 %v749_v32, %v731_v31  ;;  %v768_v35 = vpop.f32.mrf.mxu3  ;;  %v714_v37 = vadd.f32 %v713_v36, %v695_v33  ;;  %v732_v39 = vpop.f32.mrf.mxu1 }
  0xd9   :  { %v769_v38 = vadd.f32 %v768_v35, %v750_v34  ;;  %v733_v41 = vadd.f32 %v732_v39, %v714_v37 }
  0xdb   :  { %v792_v45 = vmul.f32 %v769_v38, %v769_v38  ;;  %v782_v49 = vadd.f32 %v781_v44, %v769_v38 }
  0xdd   :  { %v795_v51 = vadd.f32 %v794_v48, %v792_v45 }
  0xde   :  { %v751_v42 = vpop.f32.mrf.mxu2 }
  0xdf   :  { %v752_v46 = vadd.f32 %v751_v42, %v733_v41  ;;  %v770_v47 = vpop.f32.mrf.mxu3 }
  0xe1   :  { %v771_v50 = vadd.f32 %v770_v47, %v752_v46 }
  0xe3   :  { %v1222_v52 = vpack.c.bf16 %v771_v50, %v769_v38  ;;  %v783_v53 = vadd.f32 %v782_v49, %v771_v50  ;;  %v793_v54 = vmul.f32 %v771_v50, %v771_v50 }
  0xe5   :  { %1224 = vst [vmem:[%s1544_s2 + $0x8] sm:$0xff] %v1222_v52   ;;  %v784_v55 = vrot.slane %v783_v53, 4  ;;  %v796_v56 = vadd.f32 %v795_v51, %v793_v54 }
  0xe7   :  { %v785_v57 = vadd.f32 %v784_v55, %v783_v53  ;;  %v797_v58 = vrot.slane %v796_v56, 4 }
  0xe9   :  { %v786_v59 = vrot.slane %v785_v57, 2  ;;  %v798_v60 = vadd.f32 %v797_v58, %v796_v56 }
  0xeb   :  { %v787_v61 = vadd.f32 %v786_v59, %v785_v57  ;;  %v799_v62 = vrot.slane %v798_v60, 2 }
  0xed   :  { %v788_v63 = vrot.slane %v787_v61, 1  ;;  %v800_v0 = vadd.f32 %v799_v62, %v798_v60 }
  0xef   :  { %v801_v1 = vrot.slane %v800_v0, 1  ;;  %v789_v2 = vadd.f32 %v788_v63, %v787_v61 }
  0xf1   :  { %v802_v3 = vadd.f32 %v801_v1, %v800_v0 }
  0xf3   :  { %v804_v4 = vsel %vm803_vm0, %v789_v2, %v802_v3 }
  0xf4   :  { %805 = vst [vmem:[%s1545_s3] sm:$0x3] %v804_v4 }

</bundles_post_ra>
